<compile_context>
chip_gen: v5e
topology: v5e:2x2
jax: 0.10.0
libtpu: 0.0.40
codegen_flags: <defaults>
</compile_context>

<pallas_src>
import jax
import jax.numpy as jnp
from jax.experimental import pallas as pl
from jax.experimental.pallas import tpu as pltpu

LOG_STD_MAX = 2.0
LOG_STD_MIN = -20.0


def _round_up(x, m):
    return (x + m - 1) // m * m


def _choose_tile(B):
    """Batch tile TB and padded batch B_pad.

    - B <= 128: one sublane-aligned tile (no grid overhead to amortize).
    - B  > 128: fill up to 256 MXU rows (v6e/v7x) but keep >=2 grid steps so
      the 'parallel' batch axis is sharded across both v7x TensorCores.
      (On v5e TB=128..256 is already MXU-matched; larger only amortizes the
      ~0.35us per-step cost.)
    """
    b8 = _round_up(max(B, 1), 8)
    if b8 <= 128:
        return b8, b8
    tb = min(256, _round_up((b8 + 1) // 2, 8))
    return tb, _round_up(b8, tb)


def _soft_actor_kernel(
    x_ref, w1_ref, b1_ref, w2_ref, b2_ref,
    wh_ref, bh_ref, scale_ref, bias_ref, eps_ref,
    out_ref,
):
    A = scale_ref.shape[-1]

    # Hidden layers: bf16 MXU matmuls with f32 accumulation, f32 ReLU tail.
    xb = x_ref[...].astype(jnp.bfloat16)
    h = jnp.dot(xb, w1_ref[...], preferred_element_type=jnp.float32) + b1_ref[...]
    h = jnp.maximum(h, 0.0)
    h = jnp.dot(h.astype(jnp.bfloat16), w2_ref[...],
                preferred_element_type=jnp.float32) + b2_ref[...]
    h = jnp.maximum(h, 0.0)

    # Fused mu / log_std head: single (H2, 2A) matmul, kept in f32 (tiny MXU
    # cost, precision-sensitive since log_std feeds exp and logp).
    heads = jnp.dot(h, wh_ref[...], preferred_element_type=jnp.float32) + bh_ref[...]
    mu = heads[:, :A]
    log_std = jnp.clip(heads[:, A:], LOG_STD_MIN, LOG_STD_MAX)
    std = jnp.exp(log_std)

    # Reparameterized sample (eps == 0 gives the deterministic path).
    eps = eps_ref[...]
    a = mu + std * eps

    # Normal(mu, std).log_prob(a) summed over actions; (a - mu)/std == eps.
    logp = -0.5 * eps * eps - log_std - 0.5 * jnp.log(2.0 * jnp.pi)
    logp_pi = jnp.sum(logp, axis=-1, keepdims=True)

    # tanh-squash correction: 2*(log2 - a - softplus(-2a)), summed over actions.
    t = -2.0 * a
    softplus_t = jnp.maximum(t, 0.0) + jnp.log1p(jnp.exp(-jnp.abs(t)))
    corr = 2.0 * (jnp.log(2.0) - a - softplus_t)
    logp_pi = logp_pi - jnp.sum(corr, axis=-1, keepdims=True)

    # Squash, scale, bias.
    act = jnp.tanh(a) * scale_ref[...] + bias_ref[...]

    # Lane-dense packed store: [act | logp | zero-pad] -> (TB, OUT_W).
    pad = jnp.zeros((act.shape[0], out_ref.shape[-1] - A - 1), jnp.float32)
    out_ref[...] = jnp.concatenate([act, logp_pi, pad], axis=-1)


def prepare_params(params, action_scale, action_bias):
    """One-time (per param-update) weight prep, hoisted out of the forward.

    Casts the hidden-layer weights to bf16 and fuses the mu/log_std heads so
    the repeatedly-called forward never touches the raw f32 weights again.
    The head weights stay f32 (precision-sensitive, negligible cost).
    """
    return {
        "w1": params["w1"].astype(jnp.bfloat16),
        "b1": params["b1"],
        "w2": params["w2"].astype(jnp.bfloat16),
        "b2": params["b2"],
        "wh": jnp.concatenate([params["wmu"], params["wls"]], axis=1),
        "bh": jnp.concatenate([params["bmu"], params["bls"]], axis=1),
        "scale": action_scale,
        "bias": action_bias,
    }


@jax.jit
def soft_actor_forward(x, prepped, eps):
    """Returns (pi_action[B, A], logp_pi[B])."""
    B, S = x.shape
    A = prepped["scale"].shape[-1]
    H1 = prepped["w1"].shape[1]
    H2 = prepped["w2"].shape[1]

    # Packed output width: act (A cols) + logp (1 col), rounded to 128 lanes
    # so stores are unmasked full-lane vst.
    out_w = max(128, _round_up(A + 1, 128))

    TB, B_pad = _choose_tile(B)
    if B_pad != B:
        # Only materialized for tile-ragged batches; none for aligned B.
        x = jnp.pad(x, ((0, B_pad - B), (0, 0)))
        eps = jnp.pad(eps, ((0, B_pad - B), (0, 0)))

    grid = (B_pad // TB,)

    out = pl.pallas_call(
        _soft_actor_kernel,
        out_shape=jax.ShapeDtypeStruct((B_pad, out_w), jnp.float32),
        grid_spec=pltpu.PrefetchScalarGridSpec(
            num_scalar_prefetch=0,
            grid=grid,
            in_specs=[
                pl.BlockSpec((TB, S), lambda i: (i, 0)),       # x tile
                pl.BlockSpec((S, H1), lambda i: (0, 0)),        # w1 (resident, bf16)
                pl.BlockSpec((1, H1), lambda i: (0, 0)),        # b1
                pl.BlockSpec((H1, H2), lambda i: (0, 0)),       # w2 (resident, bf16)
                pl.BlockSpec((1, H2), lambda i: (0, 0)),        # b2
                pl.BlockSpec((H2, 2 * A), lambda i: (0, 0)),    # fused head W (f32)
                pl.BlockSpec((1, 2 * A), lambda i: (0, 0)),     # fused head b
                pl.BlockSpec((1, A), lambda i: (0, 0)),         # action_scale
                pl.BlockSpec((1, A), lambda i: (0, 0)),         # action_bias
                pl.BlockSpec((TB, A), lambda i: (i, 0)),        # eps tile
            ],
            out_specs=pl.BlockSpec((TB, out_w), lambda i: (i, 0)),
        ),
        compiler_params=pltpu.CompilerParams(
            dimension_semantics=("parallel",),          # megacore on v7x
            vmem_limit_bytes=32 * 1024 * 1024,          # safe under v7x 64 MiB
        ),
    )(x, prepped["w1"], prepped["b1"], prepped["w2"], prepped["b2"],
      prepped["wh"], prepped["bh"], prepped["scale"], prepped["bias"], eps)

    # Single contiguous slice of the useful lanes, then split in the caller.
    packed = out[:B, :A + 1]
    act = packed[:, :A]
    logp = packed[:, A]
    return act, logp


def init_params(key, state_dim, hidden_sizes, action_dim):
    """Deterministic PyTorch-Linear-style init; weights stored as (in, out)."""
    dims = [state_dim] + list(hidden_sizes)
    params = {}
    keys = jax.random.split(key, 2 * (len(dims) - 1) + 4)
    ki = 0

    def linear(kw, kb, fan_in, fan_out):
        bound = 1.0 / jnp.sqrt(fan_in)
        w = jax.random.uniform(kw, (fan_in, fan_out), jnp.float32, -bound, bound)
        b = jax.random.uniform(kb, (1, fan_out), jnp.float32, -bound, bound)
        return w, b

    for i in range(1, len(dims)):
        w, b = linear(keys[ki], keys[ki + 1], dims[i - 1], dims[i])
        ki += 2
        params[f"w{i}"] = w
        params[f"b{i}"] = b

    params["wmu"], params["bmu"] = linear(keys[ki], keys[ki + 1], dims[-1], action_dim)
    ki += 2
    params["wls"], params["bls"] = linear(keys[ki], keys[ki + 1], dims[-1], action_dim)
    return params


def reference_forward(x, params, action_scale, action_bias, eps):
    """Pure-JAX f32 reference reproducing the PyTorch forward semantics."""
    h = x
    for i in (1, 2):
        h = jax.nn.relu(h @ params[f"w{i}"] + params[f"b{i}"])
    mu = h @ params["wmu"] + params["bmu"]
    log_std = jnp.clip(h @ params["wls"] + params["bls"], LOG_STD_MIN, LOG_STD_MAX)
    std = jnp.exp(log_std)
    a = mu + std * eps
    logp = (-0.5 * ((a - mu) / std) ** 2 - log_std - 0.5 * jnp.log(2.0 * jnp.pi)).sum(-1)
    logp -= (2.0 * (jnp.log(2.0) - a - jax.nn.softplus(-2.0 * a))).sum(-1)
    act = jnp.tanh(a) * action_scale + action_bias
    return act, logp


if __name__ == "__main__":
    key = jax.random.PRNGKey(0)
    k_param, k_x, k_eps = jax.random.split(key, 3)

    # Small but grid-exercising shapes: B=256 -> 2 batch tiles of 128
    # (tile-aligned, so no per-call padding; grid=2 exercises megacore path).
    B, STATE, ACTION = 256, 32, 8
    HIDDEN = (128, 128)

    params = init_params(k_param, STATE, HIDDEN, ACTION)
    x = jax.random.normal(k_x, (B, STATE), jnp.float32)
    eps = jax.random.normal(k_eps, (B, ACTION), jnp.float32)  # rsample noise
    action_scale = jnp.full((1, ACTION), 2.0, jnp.float32)
    action_bias = jnp.full((1, ACTION), 0.5, jnp.float32)

    # One-time weight prep (hoisted out of the hot path).
    prepped = jax.tree_util.tree_map(
        lambda a: a, prepare_params(params, action_scale, action_bias))
    jax.block_until_ready(prepped)

    act, logp = soft_actor_forward(x, prepped, eps)
    jax.block_until_ready((act, logp))
    assert act.shape == (B, ACTION) and logp.shape == (B,)

    # Tolerances account for bf16 operands in the two hidden matmuls (f32
    # accumulation, f32 head matmul) vs the full-f32 reference.
    act_ref, logp_ref = reference_forward(x, params, action_scale, action_bias, eps)
    assert jnp.allclose(act, act_ref, atol=5e-2, rtol=5e-2), float(
        jnp.max(jnp.abs(act - act_ref)))
    assert jnp.allclose(logp, logp_ref, atol=2e-1, rtol=5e-2), float(
        jnp.max(jnp.abs(logp - logp_ref)))

    # Deterministic path: eps = 0 reproduces pi_action = tanh(mu)*scale + bias.
    zeros = jnp.zeros_like(eps)
    act_d, logp_d = soft_actor_forward(x, prepped, zeros)
    act_dr, logp_dr = reference_forward(x, params, action_scale, action_bias, zeros)
    jax.block_until_ready((act_d, logp_d))
    assert jnp.allclose(act_d, act_dr, atol=5e-2, rtol=5e-2)
    assert jnp.allclose(logp_d, logp_dr, atol=2e-1, rtol=5e-2)

    print("KERNEL_OK")
</pallas_src>

<mosaic_0001>
module attributes {stable_mosaic.version = 11 : i64} {
  func.func @_soft_actor_kernel(%arg0: i32, %arg1: memref<128x32xf32, #tpu.memory_space<vmem>>, %arg2: memref<32x128xbf16, #tpu.memory_space<vmem>>, %arg3: memref<1x128xf32, #tpu.memory_space<vmem>>, %arg4: memref<128x128xbf16, #tpu.memory_space<vmem>>, %arg5: memref<1x128xf32, #tpu.memory_space<vmem>>, %arg6: memref<128x16xf32, #tpu.memory_space<vmem>>, %arg7: memref<1x16xf32, #tpu.memory_space<vmem>>, %arg8: memref<1x8xf32, #tpu.memory_space<vmem>>, %arg9: memref<1x8xf32, #tpu.memory_space<vmem>>, %arg10: memref<128x8xf32, #tpu.memory_space<vmem>>, %arg11: memref<128x128xf32, #tpu.memory_space<vmem>>) attributes {dimension_semantics = [#tpu.dimension_semantics<parallel>], iteration_bounds = array<i64: 2>, scalar_prefetch = 0 : i64, scratch_operands = 0 : i64, tpu.core_type = #tpu.core_type<tc>, window_params = [{transform_indices = @transform_0, window_bounds = array<i64: 128, 32>}, {pipeline_mode = #tpu.pipeline_mode<synchronous>, transform_indices = @transform_1, window_bounds = array<i64: 32, 128>}, {pipeline_mode = #tpu.pipeline_mode<synchronous>, transform_indices = @transform_2, window_bounds = array<i64: 1, 128>}, {pipeline_mode = #tpu.pipeline_mode<synchronous>, transform_indices = @transform_3, window_bounds = array<i64: 128, 128>}, {pipeline_mode = #tpu.pipeline_mode<synchronous>, transform_indices = @transform_4, window_bounds = array<i64: 1, 128>}, {pipeline_mode = #tpu.pipeline_mode<synchronous>, transform_indices = @transform_5, window_bounds = array<i64: 128, 16>}, {pipeline_mode = #tpu.pipeline_mode<synchronous>, transform_indices = @transform_6, window_bounds = array<i64: 1, 16>}, {pipeline_mode = #tpu.pipeline_mode<synchronous>, transform_indices = @transform_7, window_bounds = array<i64: 1, 8>}, {pipeline_mode = #tpu.pipeline_mode<synchronous>, transform_indices = @transform_8, window_bounds = array<i64: 1, 8>}, {transform_indices = @transform_9, window_bounds = array<i64: 128, 8>}, {transform_indices = @transform_10, window_bounds = array<i64: 128, 128>}]} {
    %c0 = arith.constant 0 : index
    %c0_0 = arith.constant 0 : index
    %0 = vector.load %arg1[%c0, %c0_0] : memref<128x32xf32, #tpu.memory_space<vmem>>, vector<128x32xf32>
    %1 = arith.truncf %0 : vector<128x32xf32> to vector<128x32xbf16>
    %c0_1 = arith.constant 0 : index
    %c0_2 = arith.constant 0 : index
    %2 = vector.load %arg2[%c0_1, %c0_2] : memref<32x128xbf16, #tpu.memory_space<vmem>>, vector<32x128xbf16>
    %cst = arith.constant dense<0.000000e+00> : vector<128x128xf32>
    %3 = tpu.matmul %1, %2, %cst {dimension_numbers = #tpu.dot_dimension_numbers<[1], [0], [0], [1], [0, 0, 1, 1], [], []>} : vector<128x32xbf16>, vector<32x128xbf16>, vector<128x128xf32> -> vector<128x128xf32>
    %c0_3 = arith.constant 0 : index
    %c0_4 = arith.constant 0 : index
    %4 = vector.load %arg3[%c0_3, %c0_4] : memref<1x128xf32, #tpu.memory_space<vmem>>, vector<1x128xf32>
    %5 = vector.broadcast %4 : vector<1x128xf32> to vector<128x128xf32>
    %6 = arith.addf %3, %5 : vector<128x128xf32>
    %cst_5 = arith.constant 0.000000e+00 : f32
    %7 = vector.broadcast %cst_5 : f32 to vector<128x128xf32>
    %8 = arith.maximumf %6, %7 : vector<128x128xf32>
    %9 = arith.truncf %8 : vector<128x128xf32> to vector<128x128xbf16>
    %c0_6 = arith.constant 0 : index
    %c0_7 = arith.constant 0 : index
    %10 = vector.load %arg4[%c0_6, %c0_7] : memref<128x128xbf16, #tpu.memory_space<vmem>>, vector<128x128xbf16>
    %cst_8 = arith.constant dense<0.000000e+00> : vector<128x128xf32>
    %11 = tpu.matmul %9, %10, %cst_8 {dimension_numbers = #tpu.dot_dimension_numbers<[1], [0], [0], [1], [0, 0, 1, 1], [], []>} : vector<128x128xbf16>, vector<128x128xbf16>, vector<128x128xf32> -> vector<128x128xf32>
    %c0_9 = arith.constant 0 : index
    %c0_10 = arith.constant 0 : index
    %12 = vector.load %arg5[%c0_9, %c0_10] : memref<1x128xf32, #tpu.memory_space<vmem>>, vector<1x128xf32>
    %13 = vector.broadcast %12 : vector<1x128xf32> to vector<128x128xf32>
    %14 = arith.addf %11, %13 : vector<128x128xf32>
    %cst_11 = arith.constant 0.000000e+00 : f32
    %15 = vector.broadcast %cst_11 : f32 to vector<128x128xf32>
    %16 = arith.maximumf %14, %15 : vector<128x128xf32>
    %c0_12 = arith.constant 0 : index
    %c0_13 = arith.constant 0 : index
    %17 = vector.load %arg6[%c0_12, %c0_13] : memref<128x16xf32, #tpu.memory_space<vmem>>, vector<128x16xf32>
    %cst_14 = arith.constant dense<0.000000e+00> : vector<128x16xf32>
    %18 = tpu.matmul %16, %17, %cst_14 {dimension_numbers = #tpu.dot_dimension_numbers<[1], [0], [0], [1], [0, 0, 1, 1], [], []>} : vector<128x128xf32>, vector<128x16xf32>, vector<128x16xf32> -> vector<128x16xf32>
    %c0_15 = arith.constant 0 : index
    %c0_16 = arith.constant 0 : index
    %19 = vector.load %arg7[%c0_15, %c0_16] : memref<1x16xf32, #tpu.memory_space<vmem>>, vector<1x16xf32>
    %20 = vector.broadcast %19 : vector<1x16xf32> to vector<128x16xf32>
    %21 = arith.addf %18, %20 : vector<128x16xf32>
    %22 = vector.extract_strided_slice %21 {offsets = [0, 0], sizes = [128, 8], strides = [1, 1]} : vector<128x16xf32> to vector<128x8xf32>
    %23 = vector.extract_strided_slice %21 {offsets = [0, 8], sizes = [128, 8], strides = [1, 1]} : vector<128x16xf32> to vector<128x8xf32>
    %cst_17 = arith.constant -2.000000e+01 : f32
    %cst_18 = arith.constant 2.000000e+00 : f32
    %24 = vector.broadcast %cst_17 : f32 to vector<128x8xf32>
    %25 = arith.maximumf %24, %23 : vector<128x8xf32>
    %26 = vector.broadcast %cst_18 : f32 to vector<128x8xf32>
    %27 = arith.minimumf %26, %25 : vector<128x8xf32>
    %28 = math.exp %27 : vector<128x8xf32>
    %c0_19 = arith.constant 0 : index
    %c0_20 = arith.constant 0 : index
    %29 = vector.load %arg10[%c0_19, %c0_20] : memref<128x8xf32, #tpu.memory_space<vmem>>, vector<128x8xf32>
    %30 = arith.mulf %28, %29 : vector<128x8xf32>
    %31 = arith.addf %22, %30 : vector<128x8xf32>
    %cst_21 = arith.constant -5.000000e-01 : f32
    %32 = vector.broadcast %cst_21 : f32 to vector<128x8xf32>
    %33 = arith.mulf %32, %29 : vector<128x8xf32>
    %34 = arith.mulf %33, %29 : vector<128x8xf32>
    %35 = arith.subf %34, %27 : vector<128x8xf32>
    %cst_22 = arith.constant 6.28318548 : f32
    %36 = math.log %cst_22 : f32
    %cst_23 = arith.constant 5.000000e-01 : f32
    %37 = arith.mulf %cst_23, %36 : f32
    %38 = vector.broadcast %37 : f32 to vector<128x8xf32>
    %39 = arith.subf %35, %38 : vector<128x8xf32>
    %cst_24 = arith.constant dense<0.000000e+00> : vector<128xf32>
    %40 = vector.multi_reduction <add>, %39, %cst_24 [1] : vector<128x8xf32> to vector<128xf32>
    %41 = vector.shape_cast %40 : vector<128xf32> to vector<128x1xf32>
    %cst_25 = arith.constant -2.000000e+00 : f32
    %42 = vector.broadcast %cst_25 : f32 to vector<128x8xf32>
    %43 = arith.mulf %42, %31 : vector<128x8xf32>
    %cst_26 = arith.constant 0.000000e+00 : f32
    %44 = vector.broadcast %cst_26 : f32 to vector<128x8xf32>
    %45 = arith.maximumf %43, %44 : vector<128x8xf32>
    %46 = math.absf %43 : vector<128x8xf32>
    %cst_27 = arith.constant 0.000000e+00 : f32
    %47 = vector.broadcast %cst_27 : f32 to vector<128x8xf32>
    %48 = arith.subf %47, %46 : vector<128x8xf32>
    %49 = math.exp %48 : vector<128x8xf32>
    %50 = math.log1p %49 : vector<128x8xf32>
    %51 = arith.addf %45, %50 : vector<128x8xf32>
    %cst_28 = arith.constant 2.000000e+00 : f32
    %52 = math.log %cst_28 : f32
    %53 = vector.broadcast %52 : f32 to vector<128x8xf32>
    %54 = arith.subf %53, %31 : vector<128x8xf32>
    %55 = arith.subf %54, %51 : vector<128x8xf32>
    %cst_29 = arith.constant 2.000000e+00 : f32
    %56 = vector.broadcast %cst_29 : f32 to vector<128x8xf32>
    %57 = arith.mulf %56, %55 : vector<128x8xf32>
    %cst_30 = arith.constant dense<0.000000e+00> : vector<128xf32>
    %58 = vector.multi_reduction <add>, %57, %cst_30 [1] : vector<128x8xf32> to vector<128xf32>
    %59 = vector.shape_cast %58 : vector<128xf32> to vector<128x1xf32>
    %60 = arith.subf %41, %59 : vector<128x1xf32>
    %61 = math.tanh %31 : vector<128x8xf32>
    %c0_31 = arith.constant 0 : index
    %c0_32 = arith.constant 0 : index
    %62 = vector.load %arg8[%c0_31, %c0_32] : memref<1x8xf32, #tpu.memory_space<vmem>>, vector<1x8xf32>
    %63 = vector.broadcast %62 : vector<1x8xf32> to vector<128x8xf32>
    %64 = arith.mulf %61, %63 : vector<128x8xf32>
    %c0_33 = arith.constant 0 : index
    %c0_34 = arith.constant 0 : index
    %65 = vector.load %arg9[%c0_33, %c0_34] : memref<1x8xf32, #tpu.memory_space<vmem>>, vector<1x8xf32>
    %66 = vector.broadcast %65 : vector<1x8xf32> to vector<128x8xf32>
    %67 = arith.addf %64, %66 : vector<128x8xf32>
    %cst_35 = arith.constant 0.000000e+00 : f32
    %68 = vector.broadcast %cst_35 : f32 to vector<128x119xf32>
    %69 = tpu.concatenate %67, %60, %68 in 1 : vector<128x8xf32>, vector<128x1xf32>, vector<128x119xf32> -> vector<128x128xf32>
    %c0_36 = arith.constant 0 : index
    %c0_37 = arith.constant 0 : index
    %70 = vector.load %arg11[%c0_36, %c0_37] : memref<128x128xf32, #tpu.memory_space<vmem>>, vector<128x128xf32>
    tpu.vector_store %arg11[%c0_36, %c0_37], %69 {strides = array<i32>} : memref<128x128xf32, #tpu.memory_space<vmem>>, vector<128x128xf32>,
    return
  }
  func.func @transform_0(%arg0: i32) -> (i32, i32) {
    %c0_i32 = arith.constant 0 : i32
    %c0_i32_0 = arith.constant 0 : i32
    return %arg0, %c0_i32 : i32, i32
  }
  func.func @transform_1(%arg0: i32) -> (i32, i32) {
    %c0_i32 = arith.constant 0 : i32
    %c0_i32_0 = arith.constant 0 : i32
    %c0_i32_1 = arith.constant 0 : i32
    return %c0_i32, %c0_i32_0 : i32, i32
  }
  func.func @transform_2(%arg0: i32) -> (i32, i32) {
    %c0_i32 = arith.constant 0 : i32
    %c0_i32_0 = arith.constant 0 : i32
    %c0_i32_1 = arith.constant 0 : i32
    return %c0_i32, %c0_i32_0 : i32, i32
  }
  func.func @transform_3(%arg0: i32) -> (i32, i32) {
    %c0_i32 = arith.constant 0 : i32
    %c0_i32_0 = arith.constant 0 : i32
    %c0_i32_1 = arith.constant 0 : i32
    return %c0_i32, %c0_i32_0 : i32, i32
  }
  func.func @transform_4(%arg0: i32) -> (i32, i32) {
    %c0_i32 = arith.constant 0 : i32
    %c0_i32_0 = arith.constant 0 : i32
    %c0_i32_1 = arith.constant 0 : i32
    return %c0_i32, %c0_i32_0 : i32, i32
  }
  func.func @transform_5(%arg0: i32) -> (i32, i32) {
    %c0_i32 = arith.constant 0 : i32
    %c0_i32_0 = arith.constant 0 : i32
    %c0_i32_1 = arith.constant 0 : i32
    return %c0_i32, %c0_i32_0 : i32, i32
  }
  func.func @transform_6(%arg0: i32) -> (i32, i32) {
    %c0_i32 = arith.constant 0 : i32
    %c0_i32_0 = arith.constant 0 : i32
    %c0_i32_1 = arith.constant 0 : i32
    return %c0_i32, %c0_i32_0 : i32, i32
  }
  func.func @transform_7(%arg0: i32) -> (i32, i32) {
    %c0_i32 = arith.constant 0 : i32
    %c0_i32_0 = arith.constant 0 : i32
    %c0_i32_1 = arith.constant 0 : i32
    return %c0_i32, %c0_i32_0 : i32, i32
  }
  func.func @transform_8(%arg0: i32) -> (i32, i32) {
    %c0_i32 = arith.constant 0 : i32
    %c0_i32_0 = arith.constant 0 : i32
    %c0_i32_1 = arith.constant 0 : i32
    return %c0_i32, %c0_i32_0 : i32, i32
  }
  func.func @transform_9(%arg0: i32) -> (i32, i32) {
    %c0_i32 = arith.constant 0 : i32
    %c0_i32_0 = arith.constant 0 : i32
    return %arg0, %c0_i32 : i32, i32
  }
  func.func @transform_10(%arg0: i32) -> (i32, i32) {
    %c0_i32 = arith.constant 0 : i32
    %c0_i32_0 = arith.constant 0 : i32
    return %arg0, %c0_i32 : i32, i32
  }
}

</mosaic_0001>

<bundles_post_ra>
// kernel: soft_actor_forward.1
= control target key start
LH: loop header
LB: loop body
LE: loop exit
PB: predicated region body
PF: predicated region fallthrough
CT: control target
= control target key end

     0   :  { %s2026_s13 = smov 0   ;;  %s2835_s0 = inlined_call_operand.vmem [shape: f32[256,32], index: 0, kind: input, shape index: {}]   ;;  %s2836_s1 = inlined_call_operand.vmem [shape: bf16[32,128], index: 1, kind: input, shape index: {}]   ;;  %s2837_s2 = inlined_call_operand.vmem [shape: f32[1,128], index: 2, kind: input, shape index: {}]   ;;  %s2838_s3 = inlined_call_operand.vmem [shape: bf16[128,128], index: 3, kind: input, shape index: {}]   ;;  %s2839_s4 = inlined_call_operand.vmem [shape: f32[1,128], index: 4, kind: input, shape index: {}]   ;;  %s2840_s5 = inlined_call_operand.vmem [shape: f32[128,16], index: 5, kind: input, shape index: {}]   ;;  %s2841_s6 = inlined_call_operand.vmem [shape: f32[1,16], index: 6, kind: input, shape index: {}]   ;;  %s2842_s7 = inlined_call_operand.vmem [shape: f32[1,8], index: 7, kind: input, shape index: {}]   ;;  %s2843_s8 = inlined_call_operand.vmem [shape: f32[1,8], index: 8, kind: input, shape index: {}]   ;;  %s2844_s9 = inlined_call_operand.vmem [shape: f32[256,8], index: 9, kind: input, shape index: {}]   ;;  %s2845_s10 = inlined_call_operand.vmem [shape: f32[256,128], index: 10, kind: output, shape index: {}]  }
   0x1 LB: > { %s1704_s14 = sadd.s32 4294967295, %s1967_s13   ;;  %p1708_p0 = scmp.ge.s32.totalorder %s1967_s13, 1  ;;  %s1967_s13 = sphi %s2026_s13, %s20_s13  }
   0x2   : > { %p324_p1 = scmp.lt.s32.totalorder %s1967_s13, 3 }
   0x4   : > { %p325_p2 = pnand %p1708_p0, %p324_p1 }
   0x5   : > { %s1709_s17 = sshll.u32 (!%p325_p2), %s1704_s14, 4  ;;  %s1969_s25 = smov (!%p325_p2), 8  }
   0x6   : > { %328 = sbr.rel (%p325_p2) target bundleno = 887 (0x377), region = 60  ;;  %p368_p3 = scmp.lt.s32.totalorder (!%p325_p2), %s1709_s17, 31 }
   0x7   : > { %s1970_s28 = smov (!%p325_p2), 120  }
   0xb   : > { %v1782_v0 = vld [vmem:[%s2836_s1 + $0x8] sm:$0xff]  ;;  %v1781_v1 = vld [vmem:[%s2836_s1] sm:$0xff]  ;;  %s2859_s17 = smov (!%p368_p3, %s1709_s17), 31  ;;  %vm430_vm0 = vcmask 261120   ;;  %v1790_v17 = vld [vmem:[%s2838_s3 + $0x38] sm:$0xff]  ;;  %vm1114_vm1 = vcmask 64512  }
   0xc   : > { %461 = vmatpush.bf16.msra.mxu0 %v1782_v0  ;;  %s2040_s20 = sshll.u32 %s2859_s17, 3  ;;  %596 = vmatpush.bf16.msra.mxu1 %v1790_v17  ;;  %v1789_v21 = vld [vmem:[%s2838_s3 + $0x30] sm:$0xff]  ;;  %v1788_v22 = vld [vmem:[%s2838_s3 + $0x28] sm:$0xff]  ;;  %v1787_v23 = vld [vmem:[%s2838_s3 + $0x20] sm:$0xff] }
   0xd   : > { %s2046_s23 = scalar_lea.vmem %s2835_s0, %s2040_s20  ;;  %1791 = vmatpush.bf16.msra.mxu3 %v1790_v17  ;;  %v1786_v26 = vld [vmem:[%s2838_s3 + $0x18] sm:$0xff]  ;;  %v1785_v28 = vld [vmem:[%s2838_s3 + $0x10] sm:$0xff]  ;;  %v1784_v29 = vld [vmem:[%s2838_s3 + $0x8] sm:$0xff]  ;;  %s2711_s16 = scalar_lea.vmem %s2845_s10, %s2040_s20 }
   0xe   : > { %v386_v2 = vld [vmem:[%s2046_s23] sm:$0xff]  ;;  %v387_v3 = vld [vmem:[%s2046_s23 + $0x8] sm:$0xff]  ;;  %v388_v5 = vld [vmem:[%s2046_s23 + $0x10] sm:$0xff] }
   0xf   : > { %v402_v4 = vpack.c.bf16 %v387_v3, %v386_v2  ;;  %v389_v6 = vld [vmem:[%s2046_s23 + $0x18] sm:$0xff]  ;;  %v390_v8 = vld [vmem:[%s2046_s23 + $0x20] sm:$0xff]  ;;  %v391_v9 = vld [vmem:[%s2046_s23 + $0x28] sm:$0xff] }
  0x10   : > { %462 = vmatpush.bf16.msra.mxu0 %v1781_v1  ;;  %v403_v7 = vpack.c.bf16 %v389_v6, %v388_v5  ;;  %v404_v10 = vpack.c.bf16 %v391_v9, %v390_v8  ;;  %v392_v11 = vld [vmem:[%s2046_s23 + $0x30] sm:$0xff]  ;;  %v393_v12 = vld [vmem:[%s2046_s23 + $0x38] sm:$0xff]  ;;  %v394_v14 = vld [vmem:[%s2046_s23 + $0x40] sm:$0xff]  ;;  %597 = vmatpush.bf16.msra.mxu1 %v1789_v21 }
  0x11   : > { %v405_v13 = vpack.c.bf16 %v393_v12, %v392_v11  ;;  %v395_v15 = vld [vmem:[%s2046_s23 + $0x48] sm:$0xff]  ;;  %v396_v18 = vld [vmem:[%s2046_s23 + $0x50] sm:$0xff]  ;;  %v397_v19 = vld [vmem:[%s2046_s23 + $0x58] sm:$0xff]  ;;  %1792 = vmatpush.bf16.msra.mxu3 %v1789_v21 }
  0x12   : > { %v406_v16 = vpack.c.bf16 %v395_v15, %v394_v14  ;;  %v407_v20 = vpack.c.bf16 %v397_v19, %v396_v18  ;;  %v398_v24 = vld [vmem:[%s2046_s23 + $0x60] sm:$0xff]  ;;  %v399_v25 = vld [vmem:[%s2046_s23 + $0x68] sm:$0xff]  ;;  %v400_v31 = vld [vmem:[%s2046_s23 + $0x70] sm:$0xff] }
  0x13   : > { %1723 = vmatmul.msk.bf16.vlgmr.msra.gmra.mxu0 %vm430_vm0, %v402_v4  ;;  %v408_v27 = vpack.c.bf16 %v399_v25, %v398_v24  ;;  %v1783_v30 = vld [vmem:[%s2838_s3] sm:$0xff]  ;;  %v401_v32 = vld [vmem:[%s2046_s23 + $0x78] sm:$0xff]  ;;  %v675_v8 = vld [vmem:[%s2840_s5 + $0x70] sm:$0xff]  ;;  %s2174_s23 = scalar_lea.vmem %s2844_s9, %s2040_s20 }
  0x14   : > { %598 = vmatpush.bf16.msra.mxu1 %v1788_v22  ;;  %v409_v33 = vpack.c.bf16 %v401_v32, %v400_v31  ;;  %v2099_v35 = vld [vmem:[%s2837_s2] ss:$0 sm:$0xff]  ;;  %v674_v9 = vld [vmem:[%s2840_s5 + $0x68] sm:$0xff]  ;;  %v672_v14 = vld [vmem:[%s2840_s5 + $0x58] sm:$0xff] }
  0x15   : > { %1793 = vmatpush.bf16.msra.mxu3 %v1788_v22  ;;  %v673_v11 = vld [vmem:[%s2840_s5 + $0x60] sm:$0xff]  ;;  %v671_v17 = vld [vmem:[%s2840_s5 + $0x50] sm:$0xff]  ;;  %v670_v18 = vld [vmem:[%s2840_s5 + $0x48] sm:$0xff] }
  0x16   : > { %v668_v21 = vld [vmem:[%s2840_s5 + $0x38] sm:$0xff]  ;;  %v666_v24 = vld [vmem:[%s2840_s5 + $0x28] sm:$0xff]  ;;  %v665_v25 = vld [vmem:[%s2840_s5 + $0x20] sm:$0xff] }
  0x17   : > { %v663_v32 = vld [vmem:[%s2840_s5 + $0x10] sm:$0xff] }
  0x18   : > { %599 = vmatpush.bf16.msra.mxu1 %v1787_v23 }
  0x19   : > { %1794 = vmatpush.bf16.msra.mxu3 %v1787_v23  ;;  %v667_v23 = vld [vmem:[%s2840_s5 + $0x30] sm:$0xff] }
  0x1c   : > { %600 = vmatpush.bf16.msra.mxu1 %v1786_v26 }
  0x1d   : > { %1795 = vmatpush.bf16.msra.mxu3 %v1786_v26 }
  0x20   : > { %601 = vmatpush.bf16.msra.mxu1 %v1785_v28 }
  0x21   : > { %1796 = vmatpush.bf16.msra.mxu3 %v1785_v28 }
  0x23   : > { %1724 = vmatmul.msk.bf16.gmra.mxu0 %vm430_vm0, %v403_v7  ;;  %v676_v7 = vld [vmem:[%s2840_s5 + $0x78] sm:$0xff] }
  0x24   : > { %602 = vmatpush.bf16.msra.mxu1 %v1784_v29  ;;  %681 = vmatpush.msra.mxu2 %v676_v7 }
  0x25   : > { %1797 = vmatpush.bf16.msra.mxu3 %v1784_v29 }
  0x26   : > { %682 = vmatpush.msra.mxu2 %v675_v8 }
  0x28   : > { %603 = vmatpush.bf16.msra.mxu1 %v1783_v30  ;;  %683 = vmatpush.msra.mxu2 %v674_v9 }
  0x29   : > { %1798 = vmatpush.bf16.msra.mxu3 %v1783_v30 }
  0x2a   : > { %684 = vmatpush.msra.mxu2 %v673_v11 }
  0x2c   : > { %685 = vmatpush.msra.mxu2 %v672_v14 }
  0x2d   : > { %1799 = vmatpush.msrb.mxu3 %v676_v7 }
  0x2e   : > { %686 = vmatpush.msra.mxu2 %v671_v17 }
  0x2f   : > { %1800 = vmatpush.msrb.mxu3 %v675_v8 }
  0x30   : > { %687 = vmatpush.msra.mxu2 %v670_v18 }
  0x31   : > { %1801 = vmatpush.msrb.mxu3 %v674_v9  ;;  %v2210_v9 = vld [vmem:[%s2174_s23 + $0x20] sm:$0xff] }
  0x32   : > { %850 = vrot.lane.b32.xlu2 %v2210_v9, %s1969_s25 }
  0x33   : > { %1725 = vmatmul.msk.bf16.gmra.mxu0 %vm430_vm0, %v404_v10  ;;  %1802 = vmatpush.msrb.mxu3 %v673_v11 }
  0x35   : > { %1803 = vmatpush.msrb.mxu3 %v672_v14 }
  0x37   : > { %1804 = vmatpush.msrb.mxu3 %v671_v17 }
  0x39   : > { %1805 = vmatpush.msrb.mxu3 %v670_v18  ;;  %v2227_v18 = vld [vmem:[%s2174_s23 + $0x48] sm:$0xff] }
  0x43   : > { %1726 = vmatmul.msk.bf16.gmra.mxu0 %vm430_vm0, %v405_v13 }
  0x53   : > { %1727 = vmatmul.msk.bf16.gmra.mxu0 %vm430_vm0, %v406_v16 }
  0x63   : > { %1728 = vmatmul.msk.bf16.gmra.mxu0 %vm430_vm0, %v407_v20  ;;  %v669_v20 = vld [vmem:[%s2840_s5 + $0x40] sm:$0xff] }
  0x64   : > { %688 = vmatpush.msra.mxu2 %v669_v20  ;;  %1806 = vmatpush.msrb.mxu3 %v669_v20 }
  0x66   : > { %689 = vmatpush.msra.mxu2 %v668_v21  ;;  %1807 = vmatpush.msrb.mxu3 %v668_v21 }
  0x68   : > { %690 = vmatpush.msra.mxu2 %v667_v23  ;;  %1808 = vmatpush.msrb.mxu3 %v667_v23  ;;  %v2238_v23 = vld [vmem:[%s2174_s23 + $0x40] sm:$0xff] }
  0x6a   : > { %691 = vmatpush.msra.mxu2 %v666_v24  ;;  %1809 = vmatpush.msrb.mxu3 %v666_v24 }
  0x6c   : > { %692 = vmatpush.msra.mxu2 %v665_v25  ;;  %1810 = vmatpush.msrb.mxu3 %v665_v25 }
  0x73   : > { %1729 = vmatmul.msk.bf16.gmra.mxu0 %vm430_vm0, %v408_v27  ;;  %v664_v27 = vld [vmem:[%s2840_s5 + $0x18] sm:$0xff] }
  0x74   : > { %693 = vmatpush.msra.mxu2 %v664_v27  ;;  %1811 = vmatpush.msrb.mxu3 %v664_v27  ;;  %v821_v27 = vld [vmem:[%s2174_s23 + $0x58] sm:$0xff] }
  0x76   : > { %694 = vmatpush.msra.mxu2 %v663_v32  ;;  %1812 = vmatpush.msrb.mxu3 %v663_v32 }
  0x83   : > { %1730 = vmatmul.msk.bf16.gmra.mxu0 %vm430_vm0, %v409_v33  ;;  %vm1603_vm0 = vcmask 72704  }
  0x90   : > { %v464_v34 = vpop.f32.mrf.mxu0 }
  0x91   : > { %v465_v36 = vadd.f32 %v2099_v35, %v464_v34  ;;  %v662_v34 = vld [vmem:[%s2840_s5 + $0x8] sm:$0xff] }
  0x92   : > { %695 = vmatpush.msra.mxu2 %v662_v34  ;;  %1813 = vmatpush.msrb.mxu3 %v662_v34  ;;  %v2254_v34 = vld [vmem:[%s2174_s23 + $0x78] sm:$0xff] }
  0x93   : > { %v504_v39 = vmax.f32 %v465_v36, 0.0  ;;  %v661_v36 = vld [vmem:[%s2840_s5] sm:$0xff] }
  0x94   : > { %696 = vmatpush.msra.mxu2 %v661_v36  ;;  %1814 = vmatpush.msrb.mxu3 %v661_v36 }
  0x98   : > { %v466_v37 = vpop.f32.mrf.mxu0 }
  0x99   : > { %v467_v38 = vadd.f32 %v2099_v35, %v466_v37 }
  0x9b   : > { %v505_v40 = vmax.f32 %v467_v38, 0.0 }
  0x9d   : > { %v520_v41 = vpack.c.bf16 %v505_v40, %v504_v39 }
  0x9f   : > { %604 = vmatmul.bf16.vlgmr.msra.gmra.mxu1 %v520_v41 }
  0xa0   : > { %v469_v42 = vpop.f32.mrf.mxu0 }
  0xa1   : > { %v470_v43 = vadd.f32 %v2099_v35, %v469_v42 }
  0xa3   : > { %v506_v46 = vmax.f32 %v470_v43, 0.0 }
  0xa8   : > { %v471_v44 = vpop.f32.mrf.mxu0 }
  0xa9   : > { %v472_v45 = vadd.f32 %v2099_v35, %v471_v44  ;;  %v2168_v44 = vld [vmem:[%s2839_s4] ss:$0 sm:$0xff] }
  0xab   : > { %v507_v47 = vmax.f32 %v472_v45, 0.0 }
  0xad   : > { %v521_v48 = vpack.c.bf16 %v507_v47, %v506_v46  ;;  %v2178_v47 = vld [vmem:[%s2174_s23] sm:$0xff] }
  0xae   : > { %842 = vrot.lane.b32.xlu0 %v2178_v47, %s1969_s25 }
  0xaf   : > { %609 = vmatmul.bf16.gmra.mxu1 %v521_v48 }
  0xb0   : > { %v474_v49 = vpop.f32.mrf.mxu0 }
  0xb1   : > { %v475_v50 = vadd.f32 %v2099_v35, %v474_v49 }
  0xb3   : > { %v508_v53 = vmax.f32 %v475_v50, 0.0 }
  0xb8   : > { %v476_v51 = vpop.f32.mrf.mxu0 }
  0xb9   : > { %v477_v52 = vadd.f32 %v2099_v35, %v476_v51  ;;  %v2184_v51 = vld [vmem:[%s2174_s23 + $0x8] sm:$0xff] }
  0xba   : > { %844 = vrot.lane.b32.xlu0 %v2184_v51, %s1969_s25 }
  0xbb   : > { %v509_v54 = vmax.f32 %v477_v52, 0.0 }
  0xbd   : > { %v522_v55 = vpack.c.bf16 %v509_v54, %v508_v53 }
  0xbf   : > { %614 = vmatmul.bf16.gmra.mxu1 %v522_v55  ;;  %v2190_v55 = vld [vmem:[%s2174_s23 + $0x10] sm:$0xff] }
  0xc0   : > { %v479_v56 = vpop.f32.mrf.mxu0  ;;  %846 = vrot.lane.b32.xlu1 %v2190_v55, %s1969_s25 }
  0xc1   : > { %v480_v57 = vadd.f32 %v2099_v35, %v479_v56 }
  0xc3   : > { %v510_v60 = vmax.f32 %v480_v57, 0.0 }
  0xc8   : > { %v481_v58 = vpop.f32.mrf.mxu0 }
  0xc9   : > { %v482_v59 = vadd.f32 %v2099_v35, %v481_v58 }
  0xcb   : > { %v511_v61 = vmax.f32 %v482_v59, 0.0  ;;  %v2196_v59 = vld [vmem:[%s2174_s23 + $0x18] sm:$0xff] }
  0xcc   : > { %848 = vrot.lane.b32.xlu1 %v2196_v59, %s1969_s25 }
  0xcd   : > { %v523_v62 = vpack.c.bf16 %v511_v61, %v510_v60 }
  0xcf   : > { %619 = vmatmul.bf16.gmra.mxu1 %v523_v62 }
  0xd0   : > { %v484_v63 = vpop.f32.mrf.mxu0 }
  0xd1   : > { %v485_v0 = vadd.f32 %v2099_v35, %v484_v63 }
  0xd3   : > { %v512_v3 = vmax.f32 %v485_v0, 0.0 }
  0xd8   : > { %v486_v1 = vpop.f32.mrf.mxu0 }
  0xd9   : > { %v487_v2 = vadd.f32 %v2099_v35, %v486_v1 }
  0xdb   : > { %v513_v4 = vmax.f32 %v487_v2, 0.0 }
  0xdd   : > { %v524_v5 = vpack.c.bf16 %v513_v4, %v512_v3 }
  0xdf   : > { %624 = vmatmul.bf16.gmra.mxu1 %v524_v5  ;;  %v2204_v5 = vld [vmem:[%s2174_s23 + $0x30] sm:$0xff] }
  0xe0   : > { %v489_v6 = vpop.f32.mrf.mxu0  ;;  %854 = vrot.lane.b32.xlu0 %v2204_v5, %s1969_s25 }
  0xe1   : > { %v490_v10 = vadd.f32 %v2099_v35, %v489_v6 }
  0xe3   : > { %v514_v15 = vmax.f32 %v490_v10, 0.0  ;;  %v2213_v10 = vld [vmem:[%s2174_s23 + $0x38] sm:$0xff] }
  0xe4   : > { %856 = vrot.lane.b32.xlu1 %v2213_v10, %s1969_s25 }
  0xe8   : > { %v491_v12 = vpop.f32.mrf.mxu0  ;;  %860 = vrot.lane.b32.xlu0 %v2227_v18, %s1969_s25 }
  0xe9   : > { %v492_v13 = vadd.f32 %v2099_v35, %v491_v12 }
  0xeb   : > { %v515_v16 = vmax.f32 %v492_v13, 0.0  ;;  %v2221_v13 = vld [vmem:[%s2174_s23 + $0x28] sm:$0xff] }
  0xec   : > { %852 = vrot.lane.b32.xlu2 %v2221_v13, %s1969_s25 }
  0xed   : > { %v525_v19 = vpack.c.bf16 %v515_v16, %v514_v15 }
  0xef   : > { %629 = vmatmul.bf16.gmra.mxu1 %v525_v19 }
  0xf0   : > { %v494_v22 = vpop.f32.mrf.mxu0 }
  0xf1   : > { %v495_v26 = vadd.f32 %v2099_v35, %v494_v22  ;;  %v2233_v22 = vld [vmem:[%s2174_s23 + $0x50] sm:$0xff] }
  0xf2   : > { %862 = vrot.lane.b32.xlu1 %v2233_v22, %s1969_s25 }
  0xf3   : > { %v516_v30 = vmax.f32 %v495_v26, 0.0 }
  0xf4   : > { %858 = vrot.lane.b32.xlu2 %v2238_v23, %s1969_s25 }
  0xf8   : > { %v496_v28 = vpop.f32.mrf.mxu0 }
  0xf9   : > { %v497_v29 = vadd.f32 %v2099_v35, %v496_v28  ;;  %v2246_v28 = vld [vmem:[%s2174_s23 + $0x60] sm:$0xff] }
  0xfa   : > { %866 = vrot.lane.b32.xlu0 %v2246_v28, %s1969_s25 }
  0xfb   : > { %v517_v31 = vmax.f32 %v497_v29, 0.0  ;;  %v824_v29 = vld [vmem:[%s2174_s23 + $0x70] sm:$0xff] }
  0xfc   : > { %864 = vrot.lane.b32.xlu2 %v821_v27, %s1969_s25 }
  0xfd   : > { %v526_v33 = vpack.c.bf16 %v517_v31, %v516_v30 }
  0xff   : > { %634 = vmatmul.bf16.vlgmr.msra.gmra.mxu3 %v526_v33 }
 0x100   : > { %v499_v37 = vpop.f32.mrf.mxu0 }
 0x101   : > { %v500_v38 = vadd.f32 %v2099_v35, %v499_v37 }
 0x102   : > { %872 = vrot.lane.b32.xlu0 %v2254_v34, %s1969_s25 }
 0x103   : > { %v518_v41 = vmax.f32 %v500_v38, 0.0  ;;  %v823_v38 = vld [vmem:[%s2174_s23 + $0x68] sm:$0xff] }
 0x104   : > { %870 = vrot.lane.b32.xlu2 %v824_v29, %s1969_s25  ;;  %868 = vrot.lane.b32.xlu1 %v823_v38, %s1969_s25 }
 0x108   : > { %v501_v39 = vpop.f32.mrf.mxu0 }
 0x109   : > { %v502_v40 = vadd.f32 %v2099_v35, %v501_v39 }
 0x10b   : > { %v519_v42 = vmax.f32 %v502_v40, 0.0 }
 0x10d   : > { %v527_v43 = vpack.c.bf16 %v519_v42, %v518_v41 }
 0x10f   : > { %639 = vmatmul.bf16.gmra.mxu3 %v527_v43 }
 0x11c   : > { %v605_v45 = vpop.f32.mrf.mxu1 }
 0x11d   : > { %v606_v35 = vadd.f32 %v2168_v44, %v605_v45 }
 0x11f   : > { %v645_v46 = vmax.f32 %v606_v35, 0.0  ;;  %v2266_v35 = vld [vmem:[%s2841_s6] ss:$0 sm:$0xff] }
 0x121   : > { %697 = vmatmul.f32.vlgmr.msra.gmra.mxu2 %v645_v46 }
 0x124   : > { %v607_v48 = vpop.f32.mrf.mxu1 }
 0x125   : > { %v608_v49 = vadd.f32 %v2168_v44, %v607_v48 }
 0x127   : > { %v646_v50 = vmax.f32 %v608_v49, 0.0 }
 0x129   : > { %700 = vmatmul.f32.gmra.mxu2 %v646_v50 }
 0x12c   : > { %v610_v52 = vpop.f32.mrf.mxu1 }
 0x12d   : > { %v611_v53 = vadd.f32 %v2168_v44, %v610_v52 }
 0x12f   : > { %v647_v54 = vmax.f32 %v611_v53, 0.0 }
 0x131   : > { %703 = vmatmul.f32.gmra.mxu2 %v647_v54 }
 0x134   : > { %v612_v56 = vpop.f32.mrf.mxu1 }
 0x135   : > { %v613_v57 = vadd.f32 %v2168_v44, %v612_v56  ;;  %v843_v56 = vpop.permute.xlu0 %842 }
 0x137   : > { %v648_v58 = vmax.f32 %v613_v57, 0.0 }
 0x139   : > { %706 = vmatmul.f32.gmra.mxu2 %v648_v58 }
 0x13c   : > { %v615_v60 = vpop.f32.mrf.mxu1 }
 0x13d   : > { %v616_v61 = vadd.f32 %v2168_v44, %v615_v60 }
 0x13f   : > { %v649_v62 = vmax.f32 %v616_v61, 0.0 }
 0x141   : > { %709 = vmatmul.f32.gmra.mxu2 %v649_v62 }
 0x144   : > { %v617_v63 = vpop.f32.mrf.mxu1 }
 0x145   : > { %v618_v0 = vadd.f32 %v2168_v44, %v617_v63 }
 0x147   : > { %v650_v1 = vmax.f32 %v618_v0, 0.0 }
 0x149   : > { %712 = vmatmul.f32.gmra.mxu2 %v650_v1 }
 0x14c   : > { %v620_v2 = vpop.f32.mrf.mxu1 }
 0x14d   : > { %v621_v3 = vadd.f32 %v2168_v44, %v620_v2  ;;  %v845_v2 = vpop.permute.xlu0 %844 }
 0x14f   : > { %v651_v4 = vmax.f32 %v621_v3, 0.0 }
 0x151   : > { %715 = vmatmul.f32.gmra.mxu2 %v651_v4 }
 0x154   : > { %v622_v6 = vpop.f32.mrf.mxu1 }
 0x155   : > { %v623_v7 = vadd.f32 %v2168_v44, %v622_v6 }
 0x157   : > { %v652_v8 = vmax.f32 %v623_v7, 0.0 }
 0x159   : > { %718 = vmatmul.f32.gmra.mxu2 %v652_v8 }
 0x15c   : > { %v625_v11 = vpop.f32.mrf.mxu1 }
 0x15d   : > { %v626_v12 = vadd.f32 %v2168_v44, %v625_v11 }
 0x15f   : > { %v653_v14 = vmax.f32 %v626_v12, 0.0  ;;  %v847_v12 = vpop.permute.xlu1 %846 }
 0x161   : > { %721 = vmatmul.f32.gmra.mxu2 %v653_v14 }
 0x164   : > { %v627_v15 = vpop.f32.mrf.mxu1 }
 0x165   : > { %v628_v16 = vadd.f32 %v2168_v44, %v627_v15 }
 0x167   : > { %v654_v17 = vmax.f32 %v628_v16, 0.0 }
 0x169   : > { %724 = vmatmul.f32.gmra.mxu2 %v654_v17 }
 0x16c   : > { %v630_v19 = vpop.f32.mrf.mxu1 }
 0x16d   : > { %v631_v20 = vadd.f32 %v2168_v44, %v630_v19 }
 0x16f   : > { %v655_v21 = vmax.f32 %v631_v20, 0.0 }
 0x171   : > { %727 = vmatmul.f32.gmra.mxu2 %v655_v21 }
 0x174   : > { %v632_v24 = vpop.f32.mrf.mxu1 }
 0x175   : > { %v633_v25 = vadd.f32 %v2168_v44, %v632_v24 }
 0x177   : > { %v656_v26 = vmax.f32 %v633_v25, 0.0  ;;  %v849_v25 = vpop.permute.xlu1 %848 }
 0x179   : > { %730 = vmatmul.f32.gmra.mxu2 %v656_v26 }
 0x182   : > { %v635_v30 = vpop.f32.mrf.mxu3 }
 0x183   : > { %v636_v31 = vadd.f32 %v2168_v44, %v635_v30 }
 0x185   : > { %v657_v32 = vmax.f32 %v636_v31, 0.0 }
 0x187   : > { %733 = vmatmul.f32.vlgmr.msrb.gmra.mxu3 %v657_v32 }
 0x18a   : > { %v637_v33 = vpop.f32.mrf.mxu3 }
 0x18b   : > { %v638_v36 = vadd.f32 %v2168_v44, %v637_v33  ;;  %v851_v33 = vpop.permute.xlu2 %850 }
 0x18d   : > { %v658_v37 = vmax.f32 %v638_v36, 0.0 }
 0x18f   : > { %736 = vmatmul.f32.gmra.mxu3 %v658_v37 }
 0x192   : > { %v640_v39 = vpop.f32.mrf.mxu3 }
 0x193   : > { %v641_v40 = vadd.f32 %v2168_v44, %v640_v39 }
 0x195   : > { %v659_v41 = vmax.f32 %v641_v40, 0.0 }
 0x197   : > { %739 = vmatmul.f32.gmra.mxu3 %v659_v41 }
 0x19a   : > { %v642_v42 = vpop.f32.mrf.mxu3 }
 0x19b   : > { %v643_v43 = vadd.f32 %v2168_v44, %v642_v42 }
 0x19d   : > { %v660_v45 = vmax.f32 %v643_v43, 0.0 }
 0x19f   : > { %742 = vmatmul.f32.gmra.mxu3 %v660_v45  ;;  %v853_v45 = vpop.permute.xlu2 %852 }
 0x1a4   : > { %v698_v46 = vpop.f32.mrf.mxu2 }
 0x1a5   : > { %v2269_v48 = vadd.f32 %v2266_v35, %v698_v46 }
 0x1a7   : > { %v746_v49 = vmax.f32 %v2269_v48, -20.0 }
 0x1a9   : > { %v762_v50 = vmin.f32 %v746_v49, 2.0 }
 0x1ab   : > { %v778_v52 = vmul.f32 1.442695, %v762_v50  ;;  %1034 = vrot.lane.b32.xlu2 %v762_v50, %s1970_s28 }
 0x1ac   : > { %v701_v53 = vpop.f32.mrf.mxu2 }
 0x1ad   : > { %1830 = vpow2.f32 %v778_v52  ;;  %v2274_v44 = vadd.f32 %v2266_v35, %v701_v53 }
 0x1af   : > { %v747_v54 = vmax.f32 %v2274_v44, -20.0 }
 0x1b1   : > { %v763_v57 = vmin.f32 %v747_v54, 2.0 }
 0x1b3   : > { %v1831_v58 = vpop.eup %1830  ;;  %v780_v60 = vmul.f32 1.442695, %v763_v57  ;;  %1036 = vrot.lane.b32.xlu0 %v763_v57, %s1970_s28  ;;  %v855_v57 = vpop.permute.xlu0 %854 }
 0x1b4   : > { %v890_v61 = vmul.f32 %v1831_v58, %v843_v56  ;;  %v704_v62 = vpop.f32.mrf.mxu2 }
 0x1b5   : > { %1832 = vpow2.f32 %v780_v60  ;;  %v2279_v63 = vadd.f32 %v2266_v35, %v704_v62 }
 0x1b6   : > { %922 = vrot.lane.b32.xlu1 %v890_v61, %s1970_s28 }
 0x1b7   : > { %v748_v0 = vmax.f32 %v2279_v63, -20.0 }
 0x1b9   : > { %v764_v1 = vmin.f32 %v748_v0, 2.0 }
 0x1bb   : > { %v1833_v3 = vpop.eup %1832  ;;  %v782_v4 = vmul.f32 1.442695, %v764_v1 }
 0x1bc   : > { %v891_v6 = vmul.f32 %v1833_v3, %v845_v2  ;;  %v707_v7 = vpop.f32.mrf.mxu2  ;;  %v857_v3 = vpop.permute.xlu1 %856 }
 0x1bd   : > { %1834 = vpow2.f32 %v782_v4  ;;  %v2284_v8 = vadd.f32 %v2266_v35, %v707_v7 }
 0x1be   : > { %924 = vrot.lane.b32.xlu2 %v891_v6, %s1970_s28  ;;  %1038 = vrot.lane.b32.xlu1 %v764_v1, %s1970_s28 }
 0x1bf   : > { %v749_v11 = vmax.f32 %v2284_v8, -20.0 }
 0x1c1   : > { %v765_v14 = vmin.f32 %v749_v11, 2.0 }
 0x1c3   : > { %v1835_v15 = vpop.eup %1834  ;;  %v784_v16 = vmul.f32 1.442695, %v765_v14 }
 0x1c4   : > { %v892_v17 = vmul.f32 %v1835_v15, %v847_v12  ;;  %v710_v19 = vpop.f32.mrf.mxu2 }
 0x1c5   : > { %1836 = vpow2.f32 %v784_v16  ;;  %v2290_v20 = vadd.f32 %v2266_v35, %v710_v19  ;;  %v859_v19 = vpop.permute.xlu2 %858 }
 0x1c6   : > { %926 = vrot.lane.b32.xlu0 %v892_v17, %s1970_s28  ;;  %1040 = vrot.lane.b32.xlu2 %v765_v14, %s1970_s28 }
 0x1c7   : > { %v750_v21 = vmax.f32 %v2290_v20, -20.0 }
 0x1c9   : > { %v766_v24 = vmin.f32 %v750_v21, 2.0 }
 0x1cb   : > { %v1837_v26 = vpop.eup %1836  ;;  %v786_v27 = vmul.f32 1.442695, %v766_v24 }
 0x1cc   : > { %v893_v29 = vmul.f32 %v1837_v26, %v849_v25  ;;  %v713_v30 = vpop.f32.mrf.mxu2 }
 0x1cd   : > { %1838 = vpow2.f32 %v786_v27  ;;  %v2296_v31 = vadd.f32 %v2266_v35, %v713_v30 }
 0x1ce   : > { %1042 = vrot.lane.b32.xlu0 %v766_v24, %s1970_s28  ;;  %928 = vrot.lane.b32.xlu1 %v893_v29, %s1970_s28  ;;  %v861_v29 = vpop.permute.xlu0 %860 }
 0x1cf   : > { %v751_v32 = vmax.f32 %v2296_v31, -20.0 }
 0x1d1   : > { %v767_v36 = vmin.f32 %v751_v32, 2.0 }
 0x1d3   : > { %v1839_v37 = vpop.eup %1838  ;;  %v788_v38 = vmul.f32 1.442695, %v767_v36 }
 0x1d4   : > { %v894_v39 = vmul.f32 %v1839_v37, %v851_v33  ;;  %v716_v40 = vpop.f32.mrf.mxu2 }
 0x1d5   : > { %1840 = vpow2.f32 %v788_v38  ;;  %v2302_v41 = vadd.f32 %v2266_v35, %v716_v40  ;;  %v863_v40 = vpop.permute.xlu1 %862 }
 0x1d6   : > { %930 = vrot.lane.b32.xlu2 %v894_v39, %s1970_s28  ;;  %1044 = vrot.lane.b32.xlu1 %v767_v36, %s1970_s28 }
 0x1d7   : > { %v752_v42 = vmax.f32 %v2302_v41, -20.0 }
 0x1d9   : > { %v768_v43 = vmin.f32 %v752_v42, 2.0 }
 0x1db   : > { %v1841_v46 = vpop.eup %1840  ;;  %v790_v49 = vmul.f32 1.442695, %v768_v43 }
 0x1dc   : > { %v895_v50 = vmul.f32 %v1841_v46, %v853_v45  ;;  %v719_v52 = vpop.f32.mrf.mxu2 }
 0x1dd   : > { %1842 = vpow2.f32 %v790_v49  ;;  %v2308_v53 = vadd.f32 %v2266_v35, %v719_v52 }
 0x1de   : > { %932 = vrot.lane.b32.xlu0 %v895_v50, %s1970_s28  ;;  %1046 = vrot.lane.b32.xlu2 %v768_v43, %s1970_s28  ;;  %v865_v50 = vpop.permute.xlu2 %864 }
 0x1df   : > { %v753_v54 = vmax.f32 %v2308_v53, -20.0 }
 0x1e1   : > { %v769_v56 = vmin.f32 %v753_v54, 2.0 }
 0x1e3   : > { %v1843_v58 = vpop.eup %1842  ;;  %v792_v60 = vmul.f32 1.442695, %v769_v56 }
 0x1e4   : > { %v896_v61 = vmul.f32 %v1843_v58, %v855_v57  ;;  %v722_v62 = vpop.f32.mrf.mxu2 }
 0x1e5   : > { %1844 = vpow2.f32 %v792_v60  ;;  %v2314_v0 = vadd.f32 %v2266_v35, %v722_v62 }
 0x1e6   : > { %1048 = vrot.lane.b32.xlu0 %v769_v56, %s1970_s28  ;;  %934 = vrot.lane.b32.xlu1 %v896_v61, %s1970_s28 }
 0x1e7   : > { %v754_v1 = vmax.f32 %v2314_v0, -20.0 }
 0x1e9   : > { %v770_v2 = vmin.f32 %v754_v1, 2.0 }
 0x1eb   : > { %v1845_v4 = vpop.eup %1844  ;;  %v794_v6 = vmul.f32 1.442695, %v770_v2 }
 0x1ec   : > { %v897_v7 = vmul.f32 %v1845_v4, %v857_v3  ;;  %v725_v11 = vpop.f32.mrf.mxu2  ;;  %v867_v4 = vpop.permute.xlu0 %866 }
 0x1ed   : > { %1846 = vpow2.f32 %v794_v6  ;;  %v2320_v12 = vadd.f32 %v2266_v35, %v725_v11 }
 0x1ee   : > { %936 = vrot.lane.b32.xlu2 %v897_v7, %s1970_s28  ;;  %1050 = vrot.lane.b32.xlu1 %v770_v2, %s1970_s28 }
 0x1ef   : > { %v755_v14 = vmax.f32 %v2320_v12, -20.0 }
 0x1f1   : > { %v771_v15 = vmin.f32 %v755_v14, 2.0 }
 0x1f3   : > { %v1847_v16 = vpop.eup %1846  ;;  %v796_v17 = vmul.f32 1.442695, %v771_v15 }
 0x1f4   : > { %v898_v21 = vmul.f32 %v1847_v16, %v859_v19  ;;  %v728_v24 = vpop.f32.mrf.mxu2 }
 0x1f5   : > { %1848 = vpow2.f32 %v796_v17  ;;  %v2326_v25 = vadd.f32 %v2266_v35, %v728_v24 }
 0x1f6   : > { %938 = vrot.lane.b32.xlu0 %v898_v21, %s1970_s28  ;;  %1052 = vrot.lane.b32.xlu2 %v771_v15, %s1970_s28  ;;  %v869_v15 = vpop.permute.xlu1 %868 }
 0x1f7   : > { %v756_v26 = vmax.f32 %v2326_v25, -20.0 }
 0x1f9   : > { %v772_v27 = vmin.f32 %v756_v26, 2.0  ;;  %v2360_v26 = vpop.permute.xlu0 %872 }
 0x1fb   : > { %v1849_v30 = vpop.eup %1848  ;;  %v798_v32 = vmul.f32 1.442695, %v772_v27 }
 0x1fc   : > { %v899_v33 = vmul.f32 %v1849_v30, %v861_v29  ;;  %v731_v36 = vpop.f32.mrf.mxu2  ;;  %v871_v29 = vpop.permute.xlu2 %870 }
 0x1fd   : > { %1850 = vpow2.f32 %v798_v32  ;;  %v2332_v37 = vadd.f32 %v2266_v35, %v731_v36  ;;  %v986_v36 = vmul.f32 -0.5, %v2178_v47 }
 0x1fe   : > { %1054 = vrot.lane.b32.xlu0 %v772_v27, %s1970_s28  ;;  %940 = vrot.lane.b32.xlu1 %v899_v33, %s1970_s28 }
 0x1ff   : > { %v757_v38 = vmax.f32 %v2332_v37, -20.0 }
 0x201   : > { %v773_v39 = vmin.f32 %v757_v38, 2.0 }
 0x203   : > { %v1851_v42 = vpop.eup %1850  ;;  %v800_v43 = vmul.f32 1.442695, %v773_v39 }
 0x204   : > { %v900_v45 = vmul.f32 %v1851_v42, %v863_v40 }
 0x205   : > { %1852 = vpow2.f32 %v800_v43  ;;  %v1035_v33 = vpop.permute.xlu2 %1034 }
 0x206   : > { %942 = vrot.lane.b32.xlu2 %v900_v45, %s1970_s28  ;;  %1056 = vrot.lane.b32.xlu1 %v773_v39, %s1970_s28  ;;  %v987_v45 = vmul.f32 -0.5, %v2184_v51 }
 0x20a   : > { %v734_v46 = vpop.f32.mrf.mxu3 }
 0x20b   : > { %v1853_v49 = vpop.eup %1852  ;;  %v2340_v52 = vadd.f32 %v2266_v35, %v734_v46 }
 0x20c   : > { %v901_v54 = vmul.f32 %v1853_v49, %v865_v50 }
 0x20d   : > { %v758_v56 = vmax.f32 %v2340_v52, -20.0 }
 0x20e   : > { %944 = vrot.lane.b32.xlu0 %v901_v54, %s1970_s28 }
 0x20f   : > { %v774_v57 = vmin.f32 %v758_v56, 2.0  ;;  %v1003_v56 = vmul.f32 %v987_v45, %v2184_v51 }
 0x211   : > { %v802_v58 = vmul.f32 1.442695, %v774_v57  ;;  %1058 = vrot.lane.b32.xlu2 %v774_v57, %s1970_s28 }
 0x212   : > { %v737_v60 = vpop.f32.mrf.mxu3 }
 0x213   : > { %1854 = vpow2.f32 %v802_v58  ;;  %v2346_v61 = vadd.f32 %v2266_v35, %v737_v60 }
 0x215   : > { %v759_v62 = vmax.f32 %v2346_v61, -20.0 }
 0x217   : > { %v775_v1 = vmin.f32 %v759_v62, 2.0 }
 0x218   : > { %v925_v39 = vpop.permute.xlu2 %924 }
 0x219   : > { %v1855_v2 = vpop.eup %1854  ;;  %v804_v3 = vmul.f32 1.442695, %v775_v1  ;;  %1060 = vrot.lane.b32.xlu0 %v775_v1, %s1970_s28 }
 0x21a   : > { %v902_v6 = vmul.f32 %v1855_v2, %v867_v4  ;;  %v740_v7 = vpop.f32.mrf.mxu3 }
 0x21b   : > { %1856 = vpow2.f32 %v804_v3  ;;  %v2351_v11 = vadd.f32 %v2266_v35, %v740_v7 }
 0x21c   : > { %946 = vrot.lane.b32.xlu1 %v902_v6, %s1970_s28 }
 0x21d   : > { %v760_v14 = vmax.f32 %v2351_v11, -20.0 }
 0x21f   : > { %v776_v17 = vmin.f32 %v760_v14, 2.0  ;;  %v989_v14 = vmul.f32 -0.5, %v2196_v59 }
 0x220   : > { %v1041_v58 = vpop.permute.xlu2 %1040 }
 0x221   : > { %v1857_v16 = vpop.eup %1856  ;;  %v806_v62 = vmul.f32 1.442695, %v776_v17 }
 0x222   : > { %v903_v19 = vmul.f32 %v1857_v16, %v869_v15  ;;  %v743_v21 = vpop.f32.mrf.mxu3 }
 0x223   : > { %v2356_v24 = vadd.f32 %v2266_v35, %v743_v21  ;;  %v1002_v35 = vmul.f32 %v986_v36, %v2178_v47  ;;  %v1005_v21 = vmul.f32 %v989_v14, %v2196_v59 }
 0x224   : > { %948 = vrot.lane.b32.xlu2 %v903_v19, %s1970_s28  ;;  %1062 = vrot.lane.b32.xlu1 %v776_v17, %s1970_s28 }
 0x225   : > { %v761_v27 = vmax.f32 %v2356_v24, -20.0  ;;  %v1037_v32 = vpop.permute.xlu0 %1036  ;;  %v1082_v42 = vsub.f32 %v1002_v35, %v1035_v33 }
 0x226   : > { %v1083_v60 = vsub.f32 %v1003_v56, %v1037_v32 }
 0x227   : > { %v2363_v30 = vmin.f32 %v761_v27, 2.0  ;;  %v1763_v49 = vadd.f32 -0.9189385, %v1082_v42  ;;  %v1085_v42 = vsub.f32 %v1005_v21, %v1041_v58 }
 0x228   : > { %v923_v50 = vpop.permute.xlu1 %922  ;;  %v1764_v4 = vadd.f32 -0.9189385, %v1083_v60 }
 0x229   : > { %v1115_v57 = vsel %vm1114_vm1, %v1763_v49, 0.0  ;;  %v2384_v6 = vadd.f32 %v923_v50, %v2269_v48  ;;  %v808_v60 = vmul.f32 1.442695, %v2363_v30 }
 0x22a   : > { %v1118_v17 = vsel %vm1114_vm1, %v1764_v4, 0.0 }
 0x22b   : > { %v2388_v19 = vmul.f32 -2.0, %v2384_v6 }
 0x22c   : > { %1064 = vrot.lane.b32.xlu2 %v2363_v30, %s1970_s28 }
 0x22d   : > { %v1195_v32 = vand.u32 2147483647, %v2388_v19 }
 0x230   : > { %v1039_v51 = vpop.permute.xlu1 %1038  ;;  %v931_v7 = vpop.permute.xlu2 %930 }
 0x238   : > { %v927_v38 = vpop.permute.xlu0 %926  ;;  %v1047_v49 = vpop.permute.xlu2 %1046 }
 0x239   : > { %v2370_v40 = vadd.f32 %v927_v38, %v2279_v63  ;;  %v988_v63 = vmul.f32 -0.5, %v2190_v55 }
 0x23b   : > { %v2373_v43 = vmul.f32 -2.0, %v2370_v40  ;;  %v1004_v1 = vmul.f32 %v988_v63, %v2190_v55  ;;  %v2392_v55 = vadd.f32 %v925_v39, %v2274_v44  ;;  %v992_v39 = vmul.f32 -0.5, %v2204_v5 }
 0x23c   : > { %v1766_v63 = vadd.f32 -0.9189385, %v1085_v42 }
 0x23d   : > { %v1197_v46 = vand.u32 2147483647, %v2373_v43  ;;  %v1084_v15 = vsub.f32 %v1004_v1, %v1039_v51  ;;  %v2400_v35 = vmul.f32 -2.0, %v2392_v55  ;;  %v1008_v58 = vmul.f32 %v992_v39, %v2204_v5 }
 0x23e   : > { %v2427_v39 = vadd.f32 %v931_v7, %v2290_v20 }
 0x23f   : > { %v1213_v54 = vsub.f32 0.0, %v1197_v46  ;;  %v1765_v48 = vadd.f32 -0.9189385, %v1084_v15  ;;  %v1211_v46 = vsub.f32 0.0, %v1195_v32  ;;  %v1196_v56 = vand.u32 2147483647, %v2400_v35 }
 0x240   : > { %v2381_v2 = vpop.permute.xlu0 %1042  ;;  %v929_v59 = vpop.permute.xlu1 %928 }
 0x241   : > { %v1231_v47 = vmul.f32 1.442695, %v1213_v54  ;;  %v1121_v45 = vsel %vm1114_vm1, %v1765_v48, 0.0  ;;  %v1227_v1 = vmul.f32 1.442695, %v1211_v46  ;;  %v1212_v14 = vsub.f32 0.0, %v1196_v56 }
 0x242   : > { %v2413_v15 = vadd.f32 %v929_v59, %v2284_v8  ;;  %v1181_v8 = vmax.f32 %v2373_v43, 0.0  ;;  %v2436_v56 = vmul.f32 -2.0, %v2427_v39 }
 0x243   : > { %1858 = vpow2.f32 %v1231_v47  ;;  %1116 = vadd.xlane.f32.xlu0 %v1115_v57  ;;  %v1229_v30 = vmul.f32 1.442695, %v1212_v14 }
 0x244   : > { %1860 = vpow2.f32 %v806_v62  ;;  %v2419_v48 = vmul.f32 -2.0, %v2413_v15 }
 0x246   : > { %v1198_v59 = vand.u32 2147483647, %v2419_v48 }
 0x248   : > { %v2416_v21 = vpop.permute.xlu2 %936  ;;  %v1214_v7 = vsub.f32 0.0, %v1198_v59 }
 0x249   : > { %v1859_v3 = vpop.eup %1858 }
 0x24a   : > { %v1277_v16 = vadd.f32 1.0, %v1859_v3  ;;  %v1861_v36 = vpop.eup %1860  ;;  %v1280_v44 = vmul.f32 -0.5, %v1859_v3  ;;  %v1283_v62 = vand.u32 2147483647, %v1859_v3 }
 0x24c   : > { %1862 = vlog2.f32 %v1277_v16  ;;  %v1281_v57 = vadd.f32 1.0, %v1280_v44  ;;  %v1088_v16 = vsub.f32 %v1008_v58, %v1047_v49  ;;  %vm1284_vm2 = vcmp.lt.f32.partialorder %v1283_v62, 0.0004427343 }
 0x24e   : > { %1119 = vadd.xlane.f32.xlu1 %v1118_v17  ;;  %v1124_v17 = vsel %vm1114_vm1, %v1766_v63, 0.0  ;;  %v1769_v32 = vadd.f32 -0.9189385, %v1088_v16 }
 0x250   : > { %v933_v27 = vpop.permute.xlu0 %932  ;;  %v1133_v43 = vsel %vm1114_vm1, %v1769_v32, 0.0  ;;  %v1053_v63 = vpop.permute.xlu2 %1052 }
 0x251   : > { %v2397_v33 = vadd.f32 %v933_v27, %v2296_v31  ;;  %v904_v31 = vmul.f32 %v1861_v36, %v871_v29  ;;  %v1282_v29 = vmul.f32 %v1859_v3, %v1281_v57  ;;  %v2421_v27 = vpop.permute.xlu1 %1044 }
 0x252   : > { %v1863_v54 = vpop.eup %1862 }
 0x253   : > { %v2403_v38 = vmul.f32 -2.0, %v2397_v33  ;;  %v1279_v51 = vmul.f32 0.6931472, %v1863_v54 }
 0x255   : > { %v1200_v50 = vand.u32 2147483647, %v2403_v38  ;;  %1122 = vadd.xlane.f32.xlu2 %v1121_v45  ;;  %v1285_v5 = vsel %vm1284_vm2, %v1282_v29, %v1279_v51  ;;  %v1421_v45 = vsub.f32 0.6931472, %v2370_v40  ;;  %v1199_v51 = vand.u32 2147483647, %v2436_v56 }
 0x256   : > { %v1405_v36 = vadd.f32 %v1285_v5, %v1181_v8  ;;  %v1233_v29 = vmul.f32 1.442695, %v1214_v7 }
 0x257   : > { %v1216_v47 = vsub.f32 0.0, %v1200_v50  ;;  %950 = vrot.lane.b32.xlu0 %v904_v31, %s1970_s28  ;;  %v995_v50 = vmul.f32 -0.5, %v2227_v18 }
 0x258   : > { %v2424_v3 = vpop.permute.xlu0 %1048  ;;  %v1437_v31 = vsub.f32 %v1421_v45, %v1405_v36 }
 0x259   : > { %v1237_v4 = vmul.f32 1.442695, %v1216_v47  ;;  %v935_v47 = vpop.permute.xlu1 %934  ;;  %v1011_v58 = vmul.f32 %v995_v50, %v2227_v18 }
 0x25b   : > { %1864 = vpow2.f32 %v1237_v4 }
 0x25c   : > { %1866 = vpow2.f32 %v808_v60 }
 0x25d   : > { %1868 = vpow2.f32 %v1227_v1  ;;  %1125 = vadd.xlane.f32.xlu2 %v1124_v17  ;;  %v1453_v1 = vmul.f32 2.0, %v1437_v31  ;;  %v2449_v17 = vadd.f32 %v935_v47, %v2302_v41  ;;  %v1184_v41 = vmax.f32 %v2403_v38, 0.0 }
 0x25e   : > { %1870 = vpow2.f32 %v1229_v30  ;;  %v1091_v30 = vsub.f32 %v1011_v58, %v1053_v63  ;;  %v1424_v38 = vsub.f32 0.6931472, %v2397_v33 }
 0x25f   : > { %v1473_v8 = vsel %vm1114_vm1, %v1453_v1, 0.0 }
 0x260   : > { %v2462_v50 = vpop.permute.xlu2 %942 }
 0x261   : > { %v1865_v44 = vpop.eup %1864 }
 0x262   : > { %v1867_v42 = vpop.eup %1866  ;;  %v1304_v46 = vadd.f32 1.0, %v1865_v44  ;;  %v1307_v54 = vmul.f32 -0.5, %v1865_v44 }
 0x263   : > { %v2431_v49 = vpop.eup %1868  ;;  %v905_v20 = vmul.f32 %v1867_v42, %v2360_v26  ;;  %v1310_v26 = vand.u32 2147483647, %v1865_v44  ;;  %v1215_v42 = vsub.f32 0.0, %v1199_v51 }
 0x264   : > { %1872 = vlog2.f32 %v1304_v46  ;;  %v1259_v57 = vadd.f32 1.0, %v2431_v49  ;;  %v2441_v60 = vpop.eup %1870  ;;  %v1308_v4 = vadd.f32 1.0, %v1307_v54  ;;  %v1262_v59 = vmul.f32 -0.5, %v2431_v49 }
 0x265   : > { %1134 = vadd.xlane.f32.xlu2 %v1133_v43  ;;  %v1268_v18 = vadd.f32 1.0, %v2441_v60  ;;  %vm1311_vm3 = vcmp.lt.f32.partialorder %v1310_v26, 0.0004427343  ;;  %v2460_v46 = vmul.f32 -2.0, %v2449_v17  ;;  %v1772_v54 = vadd.f32 -0.9189385, %v1091_v30 }
 0x266   : > { %1874 = vlog2.f32 %v1259_v57  ;;  %v1309_v36 = vmul.f32 %v1865_v44, %v1308_v4  ;;  %v990_v44 = vmul.f32 -0.5, %v2210_v9  ;;  %v1235_v47 = vmul.f32 1.442695, %v1215_v42 }
 0x267   : > { %952 = vrot.lane.b32.xlu1 %v905_v20, %s1970_s28  ;;  %1876 = vpow2.f32 %v1233_v29  ;;  %v2465_v20 = vpop.permute.xlu1 %1050  ;;  %v1263_v63 = vadd.f32 1.0, %v1262_v59  ;;  %v1265_v58 = vand.u32 2147483647, %v2431_v49  ;;  %v1201_v1 = vand.u32 2147483647, %v2460_v46 }
 0x268   : > { %v939_v62 = vpop.permute.xlu0 %938  ;;  %1878 = vlog2.f32 %v1268_v18  ;;  %v998_v26 = vmul.f32 -0.5, %v2246_v28  ;;  %v1006_v29 = vmul.f32 %v990_v44, %v2210_v9  ;;  %v2478_v18 = vadd.f32 %v2416_v21, %v2308_v53 }
 0x269   : > { %v2446_v14 = vadd.f32 %v939_v62, %v2314_v0  ;;  %v1271_v62 = vmul.f32 -0.5, %v2441_v60  ;;  %vm2482_vm4 = vcmp.lt.f32.partialorder %v1265_v58, 0.0004427343  ;;  %v991_v9 = vmul.f32 -0.5, %v2221_v13 }
 0x26a   : > { %v1873_v16 = vpop.eup %1872  ;;  %v1217_v59 = vsub.f32 0.0, %v1201_v1  ;;  %v1086_v21 = vsub.f32 %v1006_v29, %v2381_v2 }
 0x26b   : > { %v2452_v5 = vmul.f32 -2.0, %v2446_v14  ;;  %v1306_v32 = vmul.f32 0.6931472, %v1873_v16  ;;  %v1142_v16 = vsel %vm1114_vm1, %v1772_v54, 0.0  ;;  %v1272_v42 = vadd.f32 1.0, %v1271_v62 }
 0x26c   : > { %v1875_v31 = vpop.eup %1874  ;;  %v1179_v54 = vmax.f32 %v2388_v19, 0.0  ;;  %v1767_v29 = vadd.f32 -0.9189385, %v1086_v21  ;;  %v1180_v21 = vmax.f32 %v2400_v35, 0.0 }
 0x26d   : > { %v1203_v0 = vand.u32 2147483647, %v2452_v5  ;;  %1474 = vadd.xlane.f32.xlu2 %v1473_v8  ;;  %v1312_v45 = vsel %vm1311_vm3, %v1309_v36, %v1306_v32  ;;  %v1261_v4 = vmul.f32 0.6931472, %v1875_v31  ;;  %v2471_v51 = vpop.eup %1876  ;;  %v1264_v8 = vmul.f32 %v2431_v49, %v1263_v63 }
 0x26e   : > { %v1408_v7 = vadd.f32 %v1312_v45, %v1184_v41  ;;  %v993_v32 = vmul.f32 -0.5, %v2213_v10  ;;  %v1059_v41 = vpop.permute.xlu2 %1058  ;;  %v1286_v53 = vadd.f32 1.0, %v2471_v51  ;;  %v1014_v49 = vmul.f32 %v998_v26, %v2246_v28 }
 0x26f   : > { %v1219_v43 = vsub.f32 0.0, %v1203_v0  ;;  %v1879_v0 = vpop.eup %1878  ;;  %v1267_v45 = vsel %vm2482_vm4, %v1264_v8, %v1261_v4  ;;  %v1419_v63 = vsub.f32 0.6931472, %v2384_v6  ;;  %v1273_v62 = vmul.f32 %v2441_v60, %v1272_v42 }
 0x270   : > { %v1440_v30 = vsub.f32 %v1424_v38, %v1408_v7  ;;  %v941_v31 = vpop.permute.xlu1 %940  ;;  %v1274_v38 = vand.u32 2147483647, %v2441_v60  ;;  %v1403_v2 = vadd.f32 %v1267_v45, %v1179_v54  ;;  %v1270_v28 = vmul.f32 0.6931472, %v1879_v0 }
 0x271   : > { %v1243_v57 = vmul.f32 1.442695, %v1219_v43  ;;  %v2492_v43 = vpop.permute.xlu0 %1054  ;;  %v1239_v4 = vmul.f32 1.442695, %v1217_v59  ;;  %v2507_v19 = vadd.f32 %v941_v31, %v2320_v12  ;;  %v1420_v60 = vsub.f32 0.6931472, %v2392_v55 }
 0x272   : > { %v1456_v44 = vmul.f32 2.0, %v1440_v30  ;;  %vm2511_vm5 = vcmp.lt.f32.partialorder %v1274_v38, 0.0004427343  ;;  %v1435_v42 = vsub.f32 %v1419_v63, %v1403_v2  ;;  %v1289_v12 = vmul.f32 -0.5, %v2471_v51 }
 0x273   : > { %1880 = vpow2.f32 %v1243_v57  ;;  %v2499_v57 = vmul.f32 -2.0, %v2478_v18  ;;  %v1276_v0 = vsel %vm2511_vm5, %v1273_v62, %v1270_v28  ;;  %v1127_v54 = vsel %vm1114_vm1, %v1767_v29, 0.0 }
 0x274   : > { %1882 = vpow2.f32 %v1235_v47  ;;  %v2496_v47 = vmul.f32 -0.5, %v2238_v23  ;;  %v1482_v30 = vsel %vm1114_vm1, %v1456_v44, 0.0  ;;  %v1404_v62 = vadd.f32 %v1276_v0, %v1180_v21 }
 0x275   : > { %1143 = vadd.xlane.f32.xlu2 %v1142_v16  ;;  %1884 = vlog2.f32 %v1286_v53  ;;  %v1094_v16 = vsub.f32 %v1014_v49, %v1059_v41  ;;  %v1202_v8 = vand.u32 2147483647, %v2499_v57  ;;  %v2521_v41 = vmul.f32 -2.0, %v2507_v19 }
 0x276   : > { %v1001_v49 = vmul.f32 -0.5, %v2254_v34  ;;  %v1451_v35 = vmul.f32 2.0, %v1435_v42 }
 0x277   : > { %v1775_v31 = vadd.f32 -0.9189385, %v1094_v16  ;;  %v1218_v2 = vsub.f32 0.0, %v1202_v8  ;;  %v1204_v16 = vand.u32 2147483647, %v2521_v41 }
 0x278   : > { %v2544_v21 = vpop.permute.xlu1 %1056 }
 0x279   : > { %v1881_v7 = vpop.eup %1880 }
 0x27a   : > { %v1331_v58 = vadd.f32 1.0, %v1881_v7  ;;  %v2504_v1 = vpop.eup %1882  ;;  %v1334_v26 = vmul.f32 -0.5, %v1881_v7  ;;  %v1337_v63 = vand.u32 2147483647, %v1881_v7 }
 0x27b   : > { %v1295_v59 = vadd.f32 1.0, %v2504_v1  ;;  %v1885_v38 = vpop.eup %1884 }
 0x27c   : > { %1886 = vlog2.f32 %v1331_v58  ;;  %v1335_v53 = vadd.f32 1.0, %v1334_v26  ;;  %v1007_v58 = vmul.f32 %v991_v9, %v2221_v13  ;;  %v1009_v26 = vmul.f32 %v993_v32, %v2213_v10 }
 0x27d   : > { %1483 = vadd.xlane.f32.xlu2 %v1482_v30  ;;  %1888 = vpow2.f32 %v1239_v4  ;;  %v1290_v30 = vadd.f32 1.0, %v1289_v12  ;;  %v1151_v13 = vsel %vm1114_vm1, %v1775_v31, 0.0  ;;  %vm1338_vm6 = vcmp.lt.f32.partialorder %v1337_v63, 0.0004427343 }
 0x27e   : > { %v2523_v45 = vpop.permute.xlu2 %948  ;;  %1890 = vlog2.f32 %v1295_v59  ;;  %v1336_v8 = vmul.f32 %v1881_v7, %v1335_v53  ;;  %v1292_v9 = vand.u32 2147483647, %v2471_v51  ;;  %v1241_v10 = vmul.f32 1.442695, %v1218_v2 }
 0x27f   : > { %v1288_v12 = vmul.f32 0.6931472, %v1885_v38  ;;  %v1087_v59 = vsub.f32 %v1007_v58, %v2421_v27  ;;  %v1467_v7 = vsel %vm1114_vm1, %v1451_v35, 0.0  ;;  %v1089_v31 = vsub.f32 %v1009_v26, %v2424_v3 }
 0x280   : > { %v945_v44 = vpop.permute.xlu0 %944  ;;  %v1291_v63 = vmul.f32 %v2471_v51, %v1290_v30  ;;  %vm2551_vm7 = vcmp.lt.f32.partialorder %v1292_v9, 0.0004427343  ;;  %1892 = vpow2.f32 %v1241_v10  ;;  %v1298_v26 = vmul.f32 -0.5, %v2504_v1 }
 0x281   : > { %v2530_v28 = vadd.f32 %v945_v44, %v2332_v37  ;;  %1128 = vadd.xlane.f32.xlu0 %v1127_v54  ;;  %v1187_v37 = vmax.f32 %v2452_v5, 0.0  ;;  %v1427_v5 = vsub.f32 0.6931472, %v2446_v14  ;;  %v1220_v44 = vsub.f32 0.0, %v1204_v16 }
 0x282   : > { %v1887_v4 = vpop.eup %1886  ;;  %v1294_v3 = vsel %vm2551_vm7, %v1291_v63, %v1288_v12  ;;  %v2561_v51 = vadd.f32 %v2462_v50, %v2326_v25  ;;  %v1436_v30 = vsub.f32 %v1420_v60, %v1404_v62  ;;  %v1768_v16 = vadd.f32 -0.9189385, %v1087_v59 }
 0x283   : > { %v2535_v29 = vmul.f32 -2.0, %v2530_v28  ;;  %v1333_v36 = vmul.f32 0.6931472, %v1887_v4  ;;  %v2540_v0 = vpop.eup %1888  ;;  %v1017_v4 = vmul.f32 %v1001_v49, %v2254_v34  ;;  %v1182_v49 = vmax.f32 %v2419_v48, 0.0 }
 0x284   : > { %v1891_v2 = vpop.eup %1890  ;;  %v1313_v27 = vadd.f32 1.0, %v2540_v0  ;;  %v1299_v25 = vadd.f32 1.0, %v1298_v26  ;;  %v1301_v50 = vand.u32 2147483647, %v2504_v1  ;;  %v2570_v48 = vmul.f32 -2.0, %v2561_v51 }
 0x285   : > { %v1206_v32 = vand.u32 2147483647, %v2535_v29  ;;  %1152 = vadd.xlane.f32.xlu2 %v1151_v13  ;;  %v1339_v42 = vsel %vm1338_vm6, %v1336_v8, %v1333_v36  ;;  %v1770_v8 = vadd.f32 -0.9189385, %v1089_v31  ;;  %v1245_v13 = vmul.f32 1.442695, %v1220_v44 }
 0x286   : > { %v1411_v53 = vadd.f32 %v1339_v42, %v1187_v37  ;;  %v1065_v35 = vpop.permute.xlu2 %1064  ;;  %v1406_v10 = vadd.f32 %v1294_v3, %v1182_v49  ;;  %v1422_v60 = vsub.f32 0.6931472, %v2413_v15  ;;  %v1316_v62 = vmul.f32 -0.5, %v2540_v0  ;;  %v2575_v59 = vpop.eup %1892 }
 0x287   : > { %v1222_v54 = vsub.f32 0.0, %v1206_v32  ;;  %v1097_v37 = vsub.f32 %v1017_v4, %v1065_v35  ;;  %v996_v32 = vmul.f32 -0.5, %v2233_v22  ;;  %v1183_v12 = vmax.f32 %v2436_v56, 0.0 }
 0x288   : > { %v1443_v36 = vsub.f32 %v1427_v5, %v1411_v53  ;;  %v1452_v5 = vmul.f32 2.0, %v1436_v30  ;;  %v1136_v44 = vsel %vm1114_vm1, %v1770_v8, 0.0  ;;  %v1438_v63 = vsub.f32 %v1422_v60, %v1406_v10 }
 0x289   : > { %v1249_v58 = vmul.f32 1.442695, %v1222_v54  ;;  %1468 = vadd.xlane.f32.xlu0 %v1467_v7  ;;  %v1010_v7 = vmul.f32 %v2496_v47, %v2238_v23  ;;  %v1778_v31 = vadd.f32 -0.9189385, %v1097_v37  ;;  %v1130_v54 = vsel %vm1114_vm1, %v1768_v16, 0.0 }
 0x28a   : > { %v1459_v34 = vmul.f32 2.0, %v1443_v36  ;;  %v1297_v56 = vmul.f32 0.6931472, %v1891_v2  ;;  %v1300_v23 = vmul.f32 %v2504_v1, %v1299_v25  ;;  %vm2588_vm8 = vcmp.lt.f32.partialorder %v1301_v50, 0.0004427343 }
 0x28b   : > { %1894 = vpow2.f32 %v1249_v58  ;;  %v1205_v38 = vand.u32 2147483647, %v2570_v48  ;;  %v1317_v58 = vadd.f32 1.0, %v1316_v62  ;;  %v1322_v35 = vadd.f32 1.0, %v2575_v59 }
 0x28c   : > { %v1491_v9 = vsel %vm1114_vm1, %v1459_v34, 0.0  ;;  %1896 = vlog2.f32 %v1313_v27  ;;  %v1012_v3 = vmul.f32 %v996_v32, %v2233_v22  ;;  %v2597_v26 = vadd.f32 %v2523_v45, %v2346_v61 }
 0x28d   : > { %1492 = vadd.xlane.f32.xlu2 %v1491_v9  ;;  %1898 = vpow2.f32 %v1245_v13  ;;  %v1160_v34 = vsel %vm1114_vm1, %v1778_v31, 0.0  ;;  %v1454_v49 = vmul.f32 2.0, %v1438_v63  ;;  %v1319_v30 = vand.u32 2147483647, %v2540_v0 }
 0x28e   : > { %v947_v42 = vpop.permute.xlu1 %946  ;;  %v1470_v13 = vsel %vm1114_vm1, %v1452_v5, 0.0  ;;  %v1303_v61 = vsel %vm2588_vm8, %v1300_v23, %v1297_v56  ;;  %v1221_v45 = vsub.f32 0.0, %v1205_v38  ;;  %v1090_v37 = vsub.f32 %v1010_v7, %v2465_v20 }
 0x28f   : > { %v2580_v53 = vadd.f32 %v947_v42, %v2340_v52  ;;  %v1318_v9 = vmul.f32 %v2540_v0, %v1317_v58  ;;  %v1092_v10 = vsub.f32 %v1012_v3, %v2492_v43  ;;  %v2611_v32 = vmul.f32 -2.0, %v2597_v26  ;;  %v1958_v58 = vld [vmem:[%s2174_s23 + $0x58] sm:$0xff]  ;;  %v1959_v3 = vld [vmem:[%s2174_s23 + $0x68] sm:$0xff] }
 0x290   : > { %v1476_v42 = vsel %vm1114_vm1, %v1454_v49, 0.0  ;;  %vm2614_vm9 = vcmp.lt.f32.partialorder %v1319_v30, 0.0004427343  ;;  %v1407_v43 = vadd.f32 %v1303_v61, %v1183_v12  ;;  %v1423_v0 = vsub.f32 0.6931472, %v2427_v39 }
 0x291   : > { %v1895_v4 = vpop.eup %1894  ;;  %v2585_v36 = vmul.f32 -2.0, %v2580_v53  ;;  %1137 = vadd.xlane.f32.xlu0 %v1136_v44  ;;  %1131 = vadd.xlane.f32.xlu1 %v1130_v54  ;;  %v1247_v31 = vmul.f32 1.442695, %v1221_v45  ;;  %v1771_v44 = vadd.f32 -0.9189385, %v1090_v37  ;;  %v1185_v54 = vmax.f32 %v2460_v46, 0.0 }
 0x292   : > { %v1897_v52 = vpop.eup %1896  ;;  %v1358_v27 = vadd.f32 1.0, %v1895_v4  ;;  %v1361_v1 = vmul.f32 -0.5, %v1895_v4  ;;  %v1364_v60 = vand.u32 2147483647, %v1895_v4  ;;  %v1325_v63 = vmul.f32 -0.5, %v2575_v59 }
 0x293   : > { %v1207_v2 = vand.u32 2147483647, %v2585_v36  ;;  %v2602_v16 = vpop.eup %1898  ;;  %v1315_v22 = vmul.f32 0.6931472, %v1897_v52  ;;  %v1773_v56 = vadd.f32 -0.9189385, %v1092_v10 }
 0x294   : > { %1900 = vlog2.f32 %v1358_v27  ;;  %v1362_v50 = vadd.f32 1.0, %v1361_v1  ;;  %v1340_v5 = vadd.f32 1.0, %v2602_v16  ;;  %v1208_v23 = vand.u32 2147483647, %v2611_v32 }
 0x295   : > { %v1223_v8 = vsub.f32 0.0, %v1207_v2  ;;  %1161 = vadd.xlane.f32.xlu2 %v1160_v34  ;;  %1902 = vlog2.f32 %v1322_v35  ;;  %v1321_v20 = vsel %vm2614_vm9, %v1318_v9, %v1315_v22  ;;  %v1190_v27 = vmax.f32 %v2535_v29, 0.0 }
 0x296   : > { %v1363_v52 = vmul.f32 %v1895_v4, %v1362_v50  ;;  %vm1365_vm10 = vcmp.lt.f32.partialorder %v1364_v60, 0.0004427343  ;;  %v1409_v12 = vadd.f32 %v1321_v20, %v1185_v54  ;;  %v997_v35 = vmul.f32 -0.5, %v1958_v58 }
 0x297   : > { %v1251_v25 = vmul.f32 1.442695, %v1223_v8  ;;  %v999_v2 = vmul.f32 -0.5, %v1959_v3  ;;  %v1439_v34 = vsub.f32 %v1423_v0, %v1407_v43  ;;  %v1430_v49 = vsub.f32 0.6931472, %v2530_v28 }
 0x298   : > { %v1425_v30 = vsub.f32 0.6931472, %v2449_v17  ;;  %v1326_v8 = vadd.f32 1.0, %v1325_v63  ;;  %v1224_v4 = vsub.f32 0.0, %v1208_v23  ;;  %v1139_v29 = vsel %vm1114_vm1, %v1771_v44, 0.0  ;;  %v1061_v63 = vpop.permute.xlu0 %1060 }
 0x299   : > { %1904 = vpow2.f32 %v1251_v25  ;;  %1477 = vadd.xlane.f32.xlu0 %v1476_v42  ;;  %1471 = vadd.xlane.f32.xlu1 %v1470_v13  ;;  %v1343_v22 = vmul.f32 -0.5, %v2602_v16  ;;  %v1145_v61 = vsel %vm1114_vm1, %v1773_v56, 0.0  ;;  %v1328_v10 = vand.u32 2147483647, %v2575_v59 }
 0x29a   : > { %v1901_v7 = vpop.eup %1900  ;;  %1906 = vlog2.f32 %v1340_v5  ;;  %v1441_v37 = vsub.f32 %v1425_v30, %v1409_v12  ;;  %v1013_v50 = vmul.f32 %v1958_v58, %v997_v35  ;;  %v1455_v60 = vmul.f32 2.0, %v1439_v34 }
 0x29b   : > { %v1360_v47 = vmul.f32 0.6931472, %v1901_v7  ;;  %v1903_v38 = vpop.eup %1902  ;;  %1908 = vpow2.f32 %v1247_v31  ;;  %v1253_v5 = vmul.f32 1.442695, %v1224_v4  ;;  %v1015_v20 = vmul.f32 %v1959_v3, %v999_v2 }
 0x29c   : > { %v1324_v62 = vmul.f32 0.6931472, %v1903_v38  ;;  %v1344_v43 = vadd.f32 1.0, %v1343_v22  ;;  %v1327_v0 = vmul.f32 %v2575_v59, %v1326_v8  ;;  %v1457_v31 = vmul.f32 2.0, %v1441_v37 }
 0x29d   : > { %v1366_v1 = vsel %vm1365_vm10, %v1363_v52, %v1360_v47  ;;  %v1346_v44 = vand.u32 2147483647, %v2602_v16  ;;  %vm2642_vm11 = vcmp.lt.f32.partialorder %v1328_v10, 0.0004427343  ;;  %v1479_v47 = vsel %vm1114_vm1, %v1455_v60, 0.0 }
 0x29e   : > { %v1414_v46 = vadd.f32 %v1366_v1, %v1190_v27  ;;  %v1330_v59 = vsel %vm2642_vm11, %v1327_v0, %v1324_v62  ;;  %v1093_v52 = vsub.f32 %v1013_v50, %v2544_v21  ;;  %v1345_v38 = vmul.f32 %v2602_v16, %v1344_v43 }
 0x29f   : > { %v2630_v13 = vpop.eup %1904  ;;  %v1095_v12 = vsub.f32 %v1015_v20, %v1061_v63  ;;  %v1485_v58 = vsel %vm1114_vm1, %v1457_v31, 0.0  ;;  %vm1347_vm12 = vcmp.lt.f32.partialorder %v1346_v44, 0.0004427343  ;;  %v1186_v2 = vmax.f32 %v2499_v57, 0.0  ;;  %v1063_v44 = vpop.permute.xlu1 %1062 }
 0x2a0   : > { %v1446_v45 = vsub.f32 %v1430_v49, %v1414_v46  ;;  %v1367_v9 = vadd.f32 1.0, %v2630_v13  ;;  %v1907_v25 = vpop.eup %1906  ;;  %v1370_v27 = vmul.f32 -0.5, %v2630_v13  ;;  %v1188_v21 = vmax.f32 %v2521_v41, 0.0 }
 0x2a1   : > { %1146 = vadd.xlane.f32.xlu0 %v1145_v61  ;;  %1140 = vadd.xlane.f32.xlu1 %v1139_v29  ;;  %v2640_v54 = vpop.eup %1908  ;;  %v1342_v56 = vmul.f32 0.6931472, %v1907_v25  ;;  %v1774_v34 = vadd.f32 -0.9189385, %v1093_v52  ;;  %v1410_v46 = vadd.f32 %v1330_v59, %v1186_v2  ;;  %v1776_v49 = vadd.f32 -0.9189385, %v1095_v12 }
 0x2a2   : > { %v1462_v42 = vmul.f32 2.0, %v1446_v45  ;;  %1910 = vlog2.f32 %v1367_v9  ;;  %v1349_v35 = vadd.f32 1.0, %v2640_v54  ;;  %v1371_v16 = vadd.f32 1.0, %v1370_v27  ;;  %v1960_v61 = vld [vmem:[%s2174_s23 + $0x70] sm:$0xff] }
 0x2a3   : > { %1912 = vpow2.f32 %v1253_v5  ;;  %v1348_v3 = vsel %vm1347_vm12, %v1345_v38, %v1342_v56  ;;  %v1373_v8 = vand.u32 2147483647, %v2630_v13  ;;  %v1426_v29 = vsub.f32 0.6931472, %v2478_v18 }
 0x2a4   : > { %v1500_v7 = vsel %vm1114_vm1, %v1462_v42, 0.0  ;;  %v1412_v30 = vadd.f32 %v1348_v3, %v1188_v21  ;;  %1914 = vlog2.f32 %v1349_v35  ;;  %v1000_v45 = vmul.f32 -0.5, %v1960_v61 }
 0x2a5   : > { %1501 = vadd.xlane.f32.xlu2 %v1500_v7  ;;  %v1428_v37 = vsub.f32 0.6931472, %v2507_v19  ;;  %v1148_v57 = vsel %vm1114_vm1, %v1774_v34, 0.0  ;;  %v1442_v9 = vsub.f32 %v1426_v29, %v1410_v46  ;;  %v1372_v41 = vmul.f32 %v2630_v13, %v1371_v16 }
 0x2a6   : > { %v1352_v10 = vmul.f32 -0.5, %v2640_v54  ;;  %v1154_v25 = vsel %vm1114_vm1, %v1776_v49, 0.0  ;;  %vm1374_vm13 = vcmp.lt.f32.partialorder %v1373_v8, 0.0004427343  ;;  %v1191_v5 = vmax.f32 %v2585_v36, 0.0 }
 0x2a7   : > { %v1444_v50 = vsub.f32 %v1428_v37, %v1412_v30  ;;  %v1458_v20 = vmul.f32 2.0, %v1442_v9  ;;  %v1355_v0 = vand.u32 2147483647, %v2640_v54  ;;  %v1016_v7 = vmul.f32 %v1960_v61, %v1000_v45 }
 0x2a8   : > { %v1911_v1 = vpop.eup %1910  ;;  %v1353_v43 = vadd.f32 1.0, %v1352_v10  ;;  %v1431_v56 = vsub.f32 0.6931472, %v2580_v53  ;;  %v1192_v29 = vmax.f32 %v2611_v32, 0.0  ;;  %v1432_v45 = vsub.f32 0.6931472, %v2597_v26 }
 0x2a9   : > { %1486 = vadd.xlane.f32.xlu0 %v1485_v58  ;;  %1480 = vadd.xlane.f32.xlu1 %v1479_v47  ;;  %v1913_v4 = vpop.eup %1912  ;;  %v1369_v22 = vmul.f32 0.6931472, %v1911_v1  ;;  %v1460_v31 = vmul.f32 2.0, %v1444_v50  ;;  %v1488_v23 = vsel %vm1114_vm1, %v1458_v20, 0.0  ;;  %v1096_v52 = vsub.f32 %v1016_v7, %v1063_v44 }
 0x2aa   : > { %v1376_v42 = vadd.f32 1.0, %v1913_v4  ;;  %v1915_v62 = vpop.eup %1914  ;;  %v1354_v47 = vmul.f32 %v2640_v54, %v1353_v43  ;;  %v1379_v59 = vmul.f32 -0.5, %v1913_v4  ;;  %vm1356_vm14 = vcmp.lt.f32.partialorder %v1355_v0, 0.0004427343 }
 0x2ab   : > { %v1375_v60 = vsel %vm1374_vm13, %v1372_v41, %v1369_v22  ;;  %v1351_v63 = vmul.f32 0.6931472, %v1915_v62  ;;  %v1494_v36 = vsel %vm1114_vm1, %v1460_v31, 0.0  ;;  %v1189_v58 = vmax.f32 %v2570_v48, 0.0  ;;  %v2697_v31 = vld [vmem:[%s2842_s7] ss:$0 sm:$0xff] }
 0x2ac   : > { %v1415_v13 = vadd.f32 %v1375_v60, %v1191_v5  ;;  %1916 = vlog2.f32 %v1376_v42  ;;  %v1380_v35 = vadd.f32 1.0, %v1379_v59  ;;  %v1777_v3 = vadd.f32 -0.9189385, %v1096_v52 }
 0x2ad   : > { %v1357_v27 = vsel %vm1356_vm14, %v1354_v47, %v1351_v63  ;;  %v1382_v21 = vand.u32 2147483647, %v1913_v4  ;;  %v1429_v54 = vsub.f32 0.6931472, %v2561_v51  ;;  %1918 = vtanh.f32 %v2370_v40 }
 0x2ae   : > { %v1447_v38 = vsub.f32 %v1431_v56, %v1415_v13  ;;  %v1413_v1 = vadd.f32 %v1357_v27, %v1189_v58  ;;  %v1381_v46 = vmul.f32 %v1913_v4, %v1380_v35  ;;  %v1157_v49 = vsel %vm1114_vm1, %v1777_v3, 0.0 }
 0x2af   : > { %vm1383_vm15 = vcmp.lt.f32.partialorder %v1382_v21, 0.0004427343 }
 0x2b0   : > { %v1463_v2 = vmul.f32 2.0, %v1447_v38  ;;  %v1445_v30 = vsub.f32 %v1429_v54, %v1413_v1 }
 0x2b1   : > { %1155 = vadd.xlane.f32.xlu0 %v1154_v25  ;;  %1149 = vadd.xlane.f32.xlu1 %v1148_v57 }
 0x2b2   : > { %v1917_v12 = vpop.eup %1916  ;;  %v1503_v16 = vsel %vm1114_vm1, %v1463_v2, 0.0  ;;  %v1461_v22 = vmul.f32 2.0, %v1445_v30 }
 0x2b3   : > { %v1378_v34 = vmul.f32 0.6931472, %v1917_v12 }
 0x2b4   : > { %v1497_v4 = vsel %vm1114_vm1, %v1461_v22, 0.0 }
 0x2b5   : > { %v1384_v48 = vsel %vm1383_vm15, %v1381_v46, %v1378_v34 }
 0x2b6   : > { %v2674_v8 = vpop.xlane.xlu0 %1116  ;;  %v1416_v61 = vadd.f32 %v1384_v48, %v1192_v29 }
 0x2b8   : > { %v1448_v57 = vsub.f32 %v1432_v45, %v1416_v61 }
 0x2b9   : > { %1495 = vadd.xlane.f32.xlu0 %v1494_v36  ;;  %1489 = vadd.xlane.f32.xlu1 %v1488_v23  ;;  %v2704_v23 = vld [vmem:[%s2843_s8] ss:$0 sm:$0xff] }
 0x2ba   : > { %v1464_v25 = vmul.f32 2.0, %v1448_v57 }
 0x2bc   : > { %v1506_v32 = vsel %vm1114_vm1, %v1464_v25, 0.0 }
 0x2c1   : > { %1504 = vadd.xlane.f32.xlu0 %v1503_v16  ;;  %1158 = vadd.xlane.f32.xlu1 %v1157_v49  ;;  %v2686_v62 = vpop.xlane.xlu1 %1119 }
 0x2c8   : > { %v1123_v37 = vpop.xlane.xlu2 %1122 }
 0x2c9   : > { %v951_v9 = vpop.permute.xlu0 %950  ;;  %1498 = vadd.xlane.f32.xlu1 %v1497_v4 }
 0x2ca   : > { %v2680_v41 = vadd.f32 %v951_v9, %v2351_v11  ;;  %v1919_v11 = vpop.eup %1918 }
 0x2cb   : > { %v1553_v40 = vmul.f32 %v1919_v11, %v2697_v31 }
 0x2cc   : > { %v1177_v10 = vmul.f32 -2.0, %v2680_v41  ;;  %v1433_v54 = vsub.f32 0.6931472, %v2680_v41 }
 0x2cd   : > { %v1573_v52 = vadd.f32 %v2704_v23, %v1553_v40 }
 0x2ce   : > { %v1209_v50 = vand.u32 2147483647, %v1177_v10  ;;  %v1193_v1 = vmax.f32 %v1177_v10, 0.0 }
 0x2d0   : > { %v1225_v42 = vsub.f32 0.0, %v1209_v50  ;;  %v2683_v60 = vpop.xlane.xlu2 %1125 }
 0x2d1   : > { %1507 = vadd.xlane.f32.xlu1 %v1506_v32 }
 0x2d2   : > { %v1255_v5 = vmul.f32 1.442695, %v1225_v42 }
 0x2d4   : > { %1920 = vpow2.f32 %v1255_v5 }
 0x2d8   : > { %v2689_v20 = vpop.xlane.xlu2 %1134 }
 0x2d9   : > { %v953_v43 = vpop.permute.xlu1 %952 }
 0x2da   : > { %v1921_v0 = vpop.eup %1920  ;;  %v2692_v7 = vadd.f32 %v953_v43, %v2356_v24 }
 0x2db   : > { %v1385_v13 = vadd.f32 1.0, %v1921_v0  ;;  %v1388_v63 = vmul.f32 -0.5, %v1921_v0  ;;  %v1391_v38 = vand.u32 2147483647, %v1921_v0 }
 0x2dc   : > { %v1178_v44 = vmul.f32 -2.0, %v2692_v7  ;;  %v1434_v32 = vsub.f32 0.6931472, %v2692_v7 }
 0x2dd   : > { %1922 = vlog2.f32 %v1385_v13  ;;  %v1389_v59 = vadd.f32 1.0, %v1388_v63  ;;  %vm1392_vm2 = vcmp.lt.f32.partialorder %v1391_v38, 0.0004427343 }
 0x2de   : > { %v1210_v56 = vand.u32 2147483647, %v1178_v44  ;;  %v1194_v10 = vmax.f32 %v1178_v44, 0.0 }
 0x2df   : > { %v1390_v2 = vmul.f32 %v1921_v0, %v1389_v59 }
 0x2e0   : > { %v1226_v24 = vsub.f32 0.0, %v1210_v56  ;;  %v1475_v47 = vpop.xlane.xlu2 %1474 }
 0x2e1   : > { %v1517_v36 = vsub.f32 %v1123_v37, %v1475_v47 }
 0x2e2   : > { %v1257_v27 = vmul.f32 1.442695, %v1226_v24 }
 0x2e3   : > { %v1923_v12 = vpop.eup %1922  ;;  %v1589_v58 = vsel %vm1114_vm1, %v1573_v52, %v1517_v36 }
 0x2e4   : > { %1924 = vpow2.f32 %v1257_v27  ;;  %v1606_v35 = vsel %vm1603_vm0, %v1589_v58, 0.0  ;;  %v1387_v3 = vmul.f32 0.6931472, %v1923_v12 }
 0x2e5   : > { %1622 = vst [vmem:[%s2711_s16 + $0x10] sm:$0xff] %v1606_v35 }
 0x2e6   : > { %v1393_v21 = vsel %vm1392_vm2, %v1390_v2, %v1387_v3 }
 0x2e7   : > { %v1417_v34 = vadd.f32 %v1393_v21, %v1193_v1 }
 0x2e8   : > { %v2719_v37 = vpop.xlane.xlu2 %1143 }
 0x2e9   : > { %v1449_v46 = vsub.f32 %v1433_v54, %v1417_v34 }
 0x2ea   : > { %v1925_v16 = vpop.eup %1924 }
 0x2eb   : > { %v1465_v49 = vmul.f32 2.0, %v1449_v46  ;;  %v1394_v30 = vadd.f32 1.0, %v1925_v16  ;;  %v1397_v48 = vmul.f32 -0.5, %v1925_v16  ;;  %v1400_v61 = vand.u32 2147483647, %v1925_v16 }
 0x2ed   : > { %v1509_v29 = vsel %vm1114_vm1, %v1465_v49, 0.0  ;;  %1926 = vlog2.f32 %v1394_v30  ;;  %v1398_v22 = vadd.f32 1.0, %v1397_v48  ;;  %vm1401_vm3 = vcmp.lt.f32.partialorder %v1400_v61, 0.0004427343 }
 0x2ee   : > { %1510 = vadd.xlane.f32.xlu2 %v1509_v29  ;;  %1928 = vtanh.f32 %v2384_v6 }
 0x2ef   : > { %v1399_v9 = vmul.f32 %v1925_v16, %v1398_v22  ;;  %1930 = vtanh.f32 %v2397_v33 }
 0x2f0   : > { %v1484_v0 = vpop.xlane.xlu2 %1483  ;;  %1932 = vtanh.f32 %v2392_v55 }
 0x2f1   : > { %1934 = vtanh.f32 %v2413_v15 }
 0x2f2   : > { %1936 = vtanh.f32 %v2446_v14 }
 0x2f3   : > { %v1927_v45 = vpop.eup %1926  ;;  %1938 = vtanh.f32 %v2427_v39 }
 0x2f4   : > { %v2721_v4 = vpop.xlane.xlu0 %1128  ;;  %v1396_v57 = vmul.f32 0.6931472, %v1927_v45  ;;  %v1929_v25 = vpop.eup %1928  ;;  %1940 = vtanh.f32 %v2449_v17 }
 0x2f5   : > { %v1551_v6 = vmul.f32 %v1929_v25, %v2697_v31  ;;  %v1931_v40 = vpop.eup %1930  ;;  %1942 = vtanh.f32 %v2530_v28 }
 0x2f6   : > { %v1402_v50 = vsel %vm1401_vm3, %v1399_v9, %v1396_v57  ;;  %v1556_v24 = vmul.f32 %v1931_v40, %v2697_v31  ;;  %1944 = vtanh.f32 %v2478_v18 }
 0x2f7   : > { %v1418_v42 = vadd.f32 %v1402_v50, %v1194_v10  ;;  %v1571_v13 = vadd.f32 %v2704_v23, %v1551_v6  ;;  %1946 = vtanh.f32 %v2507_v19 }
 0x2f8   : > { %v1576_v52 = vadd.f32 %v2704_v23, %v1556_v24  ;;  %v2738_v27 = vpop.xlane.xlu2 %1152  ;;  %1948 = vtanh.f32 %v2580_v53 }
 0x2f9   : > { %v1450_v5 = vsub.f32 %v1434_v32, %v1418_v42  ;;  %1950 = vtanh.f32 %v2561_v51 }
 0x2fa   : > { %1952 = vtanh.f32 %v2597_v26 }
 0x2fb   : > { %v1466_v11 = vmul.f32 2.0, %v1450_v5  ;;  %1954 = vtanh.f32 %v2680_v41 }
 0x2fc   : > { %v1469_v43 = vpop.xlane.xlu0 %1468  ;;  %1956 = vtanh.f32 %v2692_v7 }
 0x2fd   : > { %v1515_v63 = vsub.f32 %v2674_v8, %v1469_v43  ;;  %v1512_v44 = vsel %vm1114_vm1, %v1466_v11, 0.0  ;;  %v1933_v8 = vpop.eup %1932 }
 0x2fe   : > { %1513 = vadd.xlane.f32.xlu0 %v1512_v44  ;;  %v1935_v38 = vpop.eup %1934  ;;  %v1552_v58 = vmul.f32 %v1933_v8, %v2697_v31 }
 0x2ff   : > { %v1587_v56 = vsel %vm1114_vm1, %v1571_v13, %v1515_v63  ;;  %v1554_v12 = vmul.f32 %v1935_v38, %v2697_v31  ;;  %v1937_v14 = vpop.eup %1936 }
 0x300   : > { %v1604_v33 = vsel %vm1603_vm0, %v1587_v56, 0.0  ;;  %v1572_v21 = vadd.f32 %v2704_v23, %v1552_v58  ;;  %v1493_v30 = vpop.xlane.xlu2 %1492  ;;  %v1939_v39 = vpop.eup %1938 }
 0x301   : > { %1620 = vst [vmem:[%s2711_s16] sm:$0xff] %v1604_v33  ;;  %v1574_v2 = vadd.f32 %v2704_v23, %v1554_v12  ;;  %v1941_v61 = vpop.eup %1940  ;;  %v1555_v9 = vmul.f32 %v1939_v39, %v2697_v31 }
 0x302   : > { %v1557_v57 = vmul.f32 %v1941_v61, %v2697_v31  ;;  %v1943_v5 = vpop.eup %1942 }
 0x303   : > { %v1575_v6 = vadd.f32 %v2704_v23, %v1555_v9  ;;  %v1945_v40 = vpop.eup %1944 }
 0x304   : > { %v2735_v47 = vpop.xlane.xlu0 %1137  ;;  %v1132_v59 = vpop.xlane.xlu1 %1131  ;;  %v1577_v42 = vadd.f32 %v2704_v23, %v1557_v57  ;;  %v1558_v8 = vmul.f32 %v1945_v40, %v2697_v31 }
 0x305   : > { %v1520_v36 = vsub.f32 %v1132_v59, %v1484_v0  ;;  %v1947_v33 = vpop.eup %1946 }
 0x306   : > { %v1560_v59 = vmul.f32 %v1947_v33, %v2697_v31  ;;  %v1949_v53 = vpop.eup %1948 }
 0x307   : > { %v1592_v55 = vsel %vm1114_vm1, %v1576_v52, %v1520_v36 }
 0x308   : > { %v1609_v15 = vsel %vm1603_vm0, %v1592_v55, 0.0  ;;  %v2768_v10 = vpop.xlane.xlu2 %1161  ;;  %v1580_v38 = vadd.f32 %v2704_v23, %v1560_v59 }
 0x309   : > { %1625 = vst [vmem:[%s2711_s16 + $0x28] sm:$0xff] %v1609_v15  ;;  %v1578_v15 = vadd.f32 %v2704_v23, %v1558_v8 }
 0x30c   : > { %v1478_v35 = vpop.xlane.xlu0 %1477  ;;  %v1472_v3 = vpop.xlane.xlu1 %1471 }
 0x30d   : > { %v1518_v1 = vsub.f32 %v2683_v60, %v1478_v35  ;;  %v1516_v34 = vsub.f32 %v2686_v62, %v1472_v3  ;;  %v1559_v60 = vmul.f32 %v1937_v14, %v2697_v31  ;;  %v1951_v14 = vpop.eup %1950 }
 0x30f   : > { %v1590_v54 = vsel %vm1114_vm1, %v1574_v2, %v1518_v1  ;;  %v1588_v46 = vsel %vm1114_vm1, %v1572_v21, %v1516_v34  ;;  %v1579_v29 = vadd.f32 %v2704_v23, %v1559_v60  ;;  %v1563_v1 = vmul.f32 %v1949_v53, %v2697_v31  ;;  %v1953_v60 = vpop.eup %1952 }
 0x310   : > { %v1607_v16 = vsel %vm1603_vm0, %v1590_v54, 0.0  ;;  %v1605_v49 = vsel %vm1603_vm0, %v1588_v46, 0.0  ;;  %v1561_v46 = vmul.f32 %v1951_v14, %v2697_v31  ;;  %v1564_v39 = vmul.f32 %v1953_v60, %v2697_v31 }
 0x311   : > { %1623 = vst [vmem:[%s2711_s16 + $0x18] sm:$0xff] %v1607_v16 }
 0x312   : > { %1621 = vst [vmem:[%s2711_s16 + $0x8] sm:$0xff] %v1605_v49  ;;  %v1581_v49 = vadd.f32 %v2704_v23, %v1561_v46 }
 0x314   : > { %v2759_v62 = vpop.xlane.xlu0 %1146  ;;  %v1141_v48 = vpop.xlane.xlu1 %1140 }
 0x315   : > { %v1523_v22 = vsub.f32 %v1141_v48, %v1493_v30 }
 0x317   : > { %v1595_v17 = vsel %vm1114_vm1, %v1579_v29, %v1523_v22  ;;  %v1584_v29 = vadd.f32 %v2704_v23, %v1564_v39 }
 0x318   : > { %v1612_v45 = vsel %vm1603_vm0, %v1595_v17, 0.0  ;;  %v1502_v63 = vpop.xlane.xlu2 %1501 }
 0x319   : > { %1628 = vst [vmem:[%s2711_s16 + $0x40] sm:$0xff] %v1612_v45 }
 0x31c   : > { %v1487_v25 = vpop.xlane.xlu0 %1486  ;;  %v1481_v50 = vpop.xlane.xlu1 %1480 }
 0x31d   : > { %v1521_v32 = vsub.f32 %v2689_v20, %v1487_v25  ;;  %v1519_v28 = vsub.f32 %v2721_v4, %v1481_v50  ;;  %v1562_v20 = vmul.f32 %v1943_v5, %v2697_v31 }
 0x31f   : > { %v1593_v11 = vsel %vm1114_vm1, %v1577_v42, %v1521_v32  ;;  %v1591_v43 = vsel %vm1114_vm1, %v1575_v6, %v1519_v28  ;;  %v1582_v18 = vadd.f32 %v2704_v23, %v1562_v20 }
 0x320   : > { %v1610_v0 = vsel %vm1603_vm0, %v1593_v11, 0.0  ;;  %v1608_v13 = vsel %vm1603_vm0, %v1591_v43, 0.0 }
 0x321   : > { %1626 = vst [vmem:[%s2711_s16 + $0x30] sm:$0xff] %v1610_v0 }
 0x322   : > { %1624 = vst [vmem:[%s2711_s16 + $0x20] sm:$0xff] %v1608_v13 }
 0x324   : > { %v1156_v4 = vpop.xlane.xlu0 %1155  ;;  %v1150_v44 = vpop.xlane.xlu1 %1149 }
 0x325   : > { %v1526_v56 = vsub.f32 %v1150_v44, %v1502_v63 }
 0x327   : > { %v1598_v24 = vsel %vm1114_vm1, %v1582_v18, %v1526_v56 }
 0x328   : > { %v1615_v19 = vsel %vm1603_vm0, %v1598_v24, 0.0 }
 0x329   : > { %1631 = vst [vmem:[%s2711_s16 + $0x58] sm:$0xff] %v1615_v19 }
 0x32c   : > { %v1496_v52 = vpop.xlane.xlu0 %1495  ;;  %v1490_v36 = vpop.xlane.xlu1 %1489 }
 0x32d   : > { %v1524_v55 = vsub.f32 %v2719_v37, %v1496_v52  ;;  %v1522_v12 = vsub.f32 %v2735_v47, %v1490_v36  ;;  %v1583_v47 = vadd.f32 %v2704_v23, %v1563_v1 }
 0x32f   : > { %v1596_v58 = vsel %vm1114_vm1, %v1580_v38, %v1524_v55  ;;  %v1594_v35 = vsel %vm1114_vm1, %v1578_v15, %v1522_v12 }
 0x330   : > { %v1613_v3 = vsel %vm1603_vm0, %v1596_v58, 0.0  ;;  %v1611_v2 = vsel %vm1603_vm0, %v1594_v35, 0.0 }
 0x331   : > { %1629 = vst [vmem:[%s2711_s16 + $0x48] sm:$0xff] %v1613_v3 }
 0x332   : > { %1627 = vst [vmem:[%s2711_s16 + $0x38] sm:$0xff] %v1611_v2 }
 0x334   : > { %v1505_v37 = vpop.xlane.xlu0 %1504  ;;  %v1159_v21 = vpop.xlane.xlu1 %1158 }
 0x335   : > { %v1527_v34 = vsub.f32 %v2738_v27, %v1505_v37 }
 0x337   : > { %v1599_v54 = vsel %vm1114_vm1, %v1583_v47, %v1527_v34 }
 0x338   : > { %v1616_v51 = vsel %vm1603_vm0, %v1599_v54, 0.0 }
 0x339   : > { %1632 = vst [vmem:[%s2711_s16 + $0x60] sm:$0xff] %v1616_v51 }
 0x33c   : > { %v1499_v16 = vpop.xlane.xlu1 %1498 }
 0x33d   : > { %v1525_v30 = vsub.f32 %v2759_v62, %v1499_v16  ;;  %v1955_v62 = vpop.eup %1954 }
 0x33e   : > { %v1565_v45 = vmul.f32 %v1955_v62, %v2697_v31  ;;  %v1957_v32 = vpop.eup %1956 }
 0x33f   : > { %v1597_v48 = vsel %vm1114_vm1, %v1581_v49, %v1525_v30  ;;  %v1566_v6 = vmul.f32 %v1957_v32, %v2697_v31 }
 0x340   : > { %v1614_v27 = vsel %vm1603_vm0, %v1597_v48, 0.0  ;;  %v1585_v9 = vadd.f32 %v2704_v23, %v1565_v45 }
 0x341   : > { %1630 = vst [vmem:[%s2711_s16 + $0x50] sm:$0xff] %v1614_v27  ;;  %v1586_v41 = vadd.f32 %v2704_v23, %v1566_v6 }
 0x344   : > { %v1508_v26 = vpop.xlane.xlu1 %1507 }
 0x345   : > { %v1528_v22 = vsub.f32 %v1156_v4, %v1508_v26 }
 0x347   : > { %v1600_v61 = vsel %vm1114_vm1, %v1584_v29, %v1528_v22 }
 0x348   : > { %v1617_v17 = vsel %vm1603_vm0, %v1600_v61, 0.0 }
 0x349   : > { %1633 = vst [vmem:[%s2711_s16 + $0x68] sm:$0xff] %v1617_v17 }
 0x361   : > { %v1511_v57 = vpop.xlane.xlu2 %1510 }
 0x362   : > { %v1529_v25 = vsub.f32 %v1159_v21, %v1511_v57 }
 0x364   : > { %v1601_v50 = vsel %vm1114_vm1, %v1585_v9, %v1529_v25 }
 0x365   : > { %v1618_v42 = vsel %vm1603_vm0, %v1601_v50, 0.0 }
 0x366   : > { %1634 = vst [vmem:[%s2711_s16 + $0x70] sm:$0xff] %v1618_v42 }
 0x371   : > { %v1514_v28 = vpop.xlane.xlu0 %1513 }
 0x372   : > { %v1530_v5 = vsub.f32 %v2768_v10, %v1514_v28 }
 0x374   : > { %v1602_v11 = vsel %vm1114_vm1, %v1586_v41, %v1530_v5 }
 0x375   : > { %v1619_v43 = vsel %vm1603_vm0, %v1602_v11, 0.0 }
 0x376   : > { %1635 = vst [vmem:[%s2711_s16 + $0x78] sm:$0xff] %v1619_v43 }
 0x377 PF: > { %s20_s13 = sadd.s32 1, %s1967_s13  }
 0x378   : > { %p17_p4 = scmp.ge.s32.totalorder %s20_s13, 4  }
 0x37a   :  { %19 = sbr.rel (!%p17_p4) target bundleno = 1 (0x1), region = 93 }

</bundles_post_ra>
